<compile_context>
chip_gen: v5e
topology: v5e:2x2
jax: 0.10.0
libtpu: 0.0.40
codegen_flags: <defaults>
</compile_context>

<pallas_src>
import math

import jax
import jax.numpy as jnp
from jax import lax
from jax.experimental import pallas as pl
from jax.experimental.pallas import tpu as pltpu

EMBED = 256      # small stand-in for 2560 (kept a multiple of 128 lanes)
HEADS = 8
HEAD_DIM = EMBED // HEADS
SEQ = 128
BATCH = 2
INV_SCALE = 1.0 / math.sqrt(float(HEAD_DIM))


def phi_attention_kernel(x_ref, wq_ref, wk_ref, wv_ref, bq_ref, bk_ref, bv_ref,
                         wo_ref, bo_ref, o_ref, acc_ref):
    h = pl.program_id(1)

    @pl.when(h == 0)
    def _():
        acc_ref[...] = jnp.zeros_like(acc_ref)

    x = x_ref[0]                                     # (S, E) bf16

    # Per-head q/k/v projections: (S,E) x (E,D) MXU matmuls, bf16 in / f32 acc,
    # bias added in f32.
    q = jnp.dot(x, wq_ref[0], preferred_element_type=jnp.float32) + bq_ref[0]
    k = jnp.dot(x, wk_ref[0], preferred_element_type=jnp.float32) + bk_ref[0]
    v = jnp.dot(x, wv_ref[0], preferred_element_type=jnp.float32) + bv_ref[0]

    # Fold 1/sqrt(D) into q (S*D multiplies instead of S*S divides).
    q = q * INV_SCALE

    # logits = q . k contracting the head dim -- no materialized k transpose.
    logits = lax.dot_general(
        q.astype(jnp.bfloat16), k.astype(jnp.bfloat16),
        dimension_numbers=(((1,), (1,)), ((), ())),
        preferred_element_type=jnp.float32)           # (S, S) f32

    # Numerically stable softmax in f32; normalize via EUP approx reciprocal.
    logits = logits - jnp.max(logits, axis=-1, keepdims=True)
    p = jnp.exp(logits)
    p = p * pl.reciprocal(jnp.sum(p, axis=-1, keepdims=True), approx=True)

    ctx = jnp.dot(p.astype(jnp.bfloat16), v.astype(jnp.bfloat16),
                  preferred_element_type=jnp.float32)         # (S, D)

    # Per-head slice of the output projection, accumulated over heads.
    acc_ref[...] += jnp.dot(ctx.astype(jnp.bfloat16), wo_ref[0],
                            preferred_element_type=jnp.float32)  # (S, E)

    @pl.when(h == pl.num_programs(1) - 1)
    def _():
        # Single lane-dense (S, E) store (E is a multiple of 128).
        o_ref[0] = (acc_ref[...] + bo_ref[...]).astype(o_ref.dtype)
    # TODO(synk): optional attention `mask` argument not plumbed (forward is
    # exercised with mask=None; a causal mask would be applied to `logits`).


def phi_attention(x, wqkv, bqkv, wo, bo):
    N, S, E = x.shape
    H, D = HEADS, HEAD_DIM

    # --- layout plumbing (wrapper-side, not hot-path compute) ---------------
    # Split the fused (E, 3E) qkv weight (PyTorch reshape(N,S,3,H,D) column
    # ordering) into per-head q/k/v slabs of shape (H, E, D).
    w3 = wqkv.reshape(E, 3, H, D).transpose(1, 2, 0, 3)       # (3, H, E, D)
    wq, wk, wv = w3[0], w3[1], w3[2]
    b3 = bqkv.reshape(3, H, 1, D)
    bq, bk, bv = b3[0], b3[1], b3[2]                          # (H, 1, D) f32
    wo_h = wo.reshape(H, D, E)                                # (H, D, E)
    bo2 = bo.reshape(1, E)

    # bf16 operands for the MXU; accumulation stays f32 inside the kernel.
    x_bf = x.astype(jnp.bfloat16)
    wq = wq.astype(jnp.bfloat16)
    wk = wk.astype(jnp.bfloat16)
    wv = wv.astype(jnp.bfloat16)
    wo_h = wo_h.astype(jnp.bfloat16)

    return pl.pallas_call(
        phi_attention_kernel,
        out_shape=jax.ShapeDtypeStruct((N, S, E), jnp.float32),
        grid_spec=pltpu.PrefetchScalarGridSpec(
            num_scalar_prefetch=0,
            grid=(N, H),                               # head axis last = reduction
            in_specs=[
                pl.BlockSpec((1, S, E), lambda n, h: (n, 0, 0)),   # x
                pl.BlockSpec((1, E, D), lambda n, h: (h, 0, 0)),   # W_q[h]
                pl.BlockSpec((1, E, D), lambda n, h: (h, 0, 0)),   # W_k[h]
                pl.BlockSpec((1, E, D), lambda n, h: (h, 0, 0)),   # W_v[h]
                pl.BlockSpec((1, 1, D), lambda n, h: (h, 0, 0)),   # b_q[h]
                pl.BlockSpec((1, 1, D), lambda n, h: (h, 0, 0)),   # b_k[h]
                pl.BlockSpec((1, 1, D), lambda n, h: (h, 0, 0)),   # b_v[h]
                pl.BlockSpec((1, D, E), lambda n, h: (h, 0, 0)),   # W_out[h]
                pl.BlockSpec((1, E), lambda n, h: (0, 0)),         # b_out
            ],
            out_specs=pl.BlockSpec((1, S, E), lambda n, h: (n, 0, 0)),
            scratch_shapes=[pltpu.VMEM((S, E), jnp.float32)],
        ),
        compiler_params=pltpu.CompilerParams(
            dimension_semantics=("parallel", "arbitrary"),
            vmem_limit_bytes=32 * 1024 * 1024,
        ),
    )(x_bf, wq, wk, wv, bq, bk, bv, wo_h, bo2)


def reference(x, wqkv, bqkv, wo, bo):
    N, S, E = x.shape
    qkv = x @ wqkv + bqkv                                            # (N, S, 3E)
    qkv = qkv.reshape(N, S, 3, HEADS, HEAD_DIM).transpose(2, 0, 3, 1, 4)
    q, k, v = qkv[0], qkv[1], qkv[2]                                 # (N, H, S, D)
    attn = jnp.einsum('nhqd,nhkd->nhqk', q, k) / math.sqrt(float(HEAD_DIM))
    attn = jax.nn.softmax(attn, axis=-1)
    out = jnp.einsum('nhqk,nhkd->nhqd', attn, v)
    out = out.transpose(0, 2, 1, 3).reshape(N, S, E)
    return out @ wo + bo


if __name__ == "__main__":
    key = jax.random.PRNGKey(0)
    k_x, k_wqkv, k_bqkv, k_wo, k_bo = jax.random.split(key, 5)

    x = jax.random.normal(k_x, (BATCH, SEQ, EMBED), dtype=jnp.float32)
    wqkv = 0.02 * jax.random.normal(k_wqkv, (EMBED, 3 * EMBED), dtype=jnp.float32)
    bqkv = 0.02 * jax.random.normal(k_bqkv, (1, 3 * EMBED), dtype=jnp.float32)
    wo = 0.02 * jax.random.normal(k_wo, (EMBED, EMBED), dtype=jnp.float32)
    bo = 0.02 * jax.random.normal(k_bo, (1, EMBED), dtype=jnp.float32)

    out = phi_attention(x, wqkv, bqkv, wo, bo)
    out = jax.block_until_ready(out)

    ref = reference(x, wqkv, bqkv, wo, bo)
    assert out.shape == (BATCH, SEQ, EMBED)
    # bf16 MXU operands + approx reciprocal -> looser tolerance vs f32 reference.
    assert jnp.allclose(out, ref, atol=2e-2, rtol=2e-2), "mismatch vs reference"
    print("KERNEL_OK")
</pallas_src>

<mosaic_0001>
module attributes {stable_mosaic.version = 11 : i64} {
  func.func @phi_attention_kernel(%arg0: i32, %arg1: i32, %arg2: memref<1x128x256xbf16, #tpu.memory_space<vmem>>, %arg3: memref<1x256x32xbf16, #tpu.memory_space<vmem>>, %arg4: memref<1x256x32xbf16, #tpu.memory_space<vmem>>, %arg5: memref<1x256x32xbf16, #tpu.memory_space<vmem>>, %arg6: memref<1x1x32xf32, #tpu.memory_space<vmem>>, %arg7: memref<1x1x32xf32, #tpu.memory_space<vmem>>, %arg8: memref<1x1x32xf32, #tpu.memory_space<vmem>>, %arg9: memref<1x32x256xbf16, #tpu.memory_space<vmem>>, %arg10: memref<1x256xf32, #tpu.memory_space<vmem>>, %arg11: memref<1x128x256xf32, #tpu.memory_space<vmem>>, %arg12: memref<128x256xf32, #tpu.memory_space<vmem>>) attributes {dimension_semantics = [#tpu.dimension_semantics<parallel>, #tpu.dimension_semantics<arbitrary>], iteration_bounds = array<i64: 2, 8>, scalar_prefetch = 0 : i64, scratch_operands = 1 : i64, tpu.core_type = #tpu.core_type<tc>, window_params = [{transform_indices = @transform_0, window_bounds = array<i64: 1, 128, 256>}, {transform_indices = @transform_1, window_bounds = array<i64: 1, 256, 32>}, {transform_indices = @transform_2, window_bounds = array<i64: 1, 256, 32>}, {transform_indices = @transform_3, window_bounds = array<i64: 1, 256, 32>}, {transform_indices = @transform_4, window_bounds = array<i64: 1, 1, 32>}, {transform_indices = @transform_5, window_bounds = array<i64: 1, 1, 32>}, {transform_indices = @transform_6, window_bounds = array<i64: 1, 1, 32>}, {transform_indices = @transform_7, window_bounds = array<i64: 1, 32, 256>}, {pipeline_mode = #tpu.pipeline_mode<synchronous>, transform_indices = @transform_8, window_bounds = array<i64: 1, 256>}, {transform_indices = @transform_9, window_bounds = array<i64: 1, 128, 256>}]} {
    %c0_i32 = arith.constant 0 : i32
    %0 = arith.cmpi eq, %arg1, %c0_i32 : i32
    %1 = arith.extui %0 : i1 to i32
    %c0_i32_0 = arith.constant 0 : i32
    %2 = arith.cmpi ne, %1, %c0_i32_0 : i32
    scf.if %2 {
      %cst_37 = arith.constant 0.000000e+00 : f32
      %54 = vector.broadcast %cst_37 : f32 to vector<128x256xf32>
      %c0_38 = arith.constant 0 : index
      %c0_39 = arith.constant 0 : index
      %55 = vector.load %arg12[%c0_38, %c0_39] : memref<128x256xf32, #tpu.memory_space<vmem>>, vector<128x256xf32>
      tpu.vector_store %arg12[%c0_38, %c0_39], %54 {strides = array<i32>} : memref<128x256xf32, #tpu.memory_space<vmem>>, vector<128x256xf32>,
    } else {
    }
    %c0 = arith.constant 0 : index
    %c0_1 = arith.constant 0 : index
    %c0_2 = arith.constant 0 : index
    %3 = vector.load %arg2[%c0, %c0_1, %c0_2] : memref<1x128x256xbf16, #tpu.memory_space<vmem>>, vector<1x128x256xbf16>
    %4 = vector.shape_cast %3 : vector<1x128x256xbf16> to vector<128x256xbf16>
    %c0_3 = arith.constant 0 : index
    %c0_4 = arith.constant 0 : index
    %c0_5 = arith.constant 0 : index
    %5 = vector.load %arg3[%c0_3, %c0_4, %c0_5] : memref<1x256x32xbf16, #tpu.memory_space<vmem>>, vector<1x256x32xbf16>
    %6 = vector.shape_cast %5 : vector<1x256x32xbf16> to vector<256x32xbf16>
    %cst = arith.constant dense<0.000000e+00> : vector<128x32xf32>
    %7 = tpu.matmul %4, %6, %cst {dimension_numbers = #tpu.dot_dimension_numbers<[1], [0], [0], [1], [0, 0, 1, 1], [], []>} : vector<128x256xbf16>, vector<256x32xbf16>, vector<128x32xf32> -> vector<128x32xf32>
    %c0_6 = arith.constant 0 : index
    %c0_7 = arith.constant 0 : index
    %c0_8 = arith.constant 0 : index
    %8 = vector.load %arg6[%c0_6, %c0_7, %c0_8] : memref<1x1x32xf32, #tpu.memory_space<vmem>>, vector<1x1x32xf32>
    %9 = vector.shape_cast %8 : vector<1x1x32xf32> to vector<1x32xf32>
    %10 = vector.broadcast %9 : vector<1x32xf32> to vector<128x32xf32>
    %11 = arith.addf %7, %10 : vector<128x32xf32>
    %c0_9 = arith.constant 0 : index
    %c0_10 = arith.constant 0 : index
    %c0_11 = arith.constant 0 : index
    %12 = vector.load %arg4[%c0_9, %c0_10, %c0_11] : memref<1x256x32xbf16, #tpu.memory_space<vmem>>, vector<1x256x32xbf16>
    %13 = vector.shape_cast %12 : vector<1x256x32xbf16> to vector<256x32xbf16>
    %cst_12 = arith.constant dense<0.000000e+00> : vector<128x32xf32>
    %14 = tpu.matmul %4, %13, %cst_12 {dimension_numbers = #tpu.dot_dimension_numbers<[1], [0], [0], [1], [0, 0, 1, 1], [], []>} : vector<128x256xbf16>, vector<256x32xbf16>, vector<128x32xf32> -> vector<128x32xf32>
    %c0_13 = arith.constant 0 : index
    %c0_14 = arith.constant 0 : index
    %c0_15 = arith.constant 0 : index
    %15 = vector.load %arg7[%c0_13, %c0_14, %c0_15] : memref<1x1x32xf32, #tpu.memory_space<vmem>>, vector<1x1x32xf32>
    %16 = vector.shape_cast %15 : vector<1x1x32xf32> to vector<1x32xf32>
    %17 = vector.broadcast %16 : vector<1x32xf32> to vector<128x32xf32>
    %18 = arith.addf %14, %17 : vector<128x32xf32>
    %c0_16 = arith.constant 0 : index
    %c0_17 = arith.constant 0 : index
    %c0_18 = arith.constant 0 : index
    %19 = vector.load %arg5[%c0_16, %c0_17, %c0_18] : memref<1x256x32xbf16, #tpu.memory_space<vmem>>, vector<1x256x32xbf16>
    %20 = vector.shape_cast %19 : vector<1x256x32xbf16> to vector<256x32xbf16>
    %cst_19 = arith.constant dense<0.000000e+00> : vector<128x32xf32>
    %21 = tpu.matmul %4, %20, %cst_19 {dimension_numbers = #tpu.dot_dimension_numbers<[1], [0], [0], [1], [0, 0, 1, 1], [], []>} : vector<128x256xbf16>, vector<256x32xbf16>, vector<128x32xf32> -> vector<128x32xf32>
    %c0_20 = arith.constant 0 : index
    %c0_21 = arith.constant 0 : index
    %c0_22 = arith.constant 0 : index
    %22 = vector.load %arg8[%c0_20, %c0_21, %c0_22] : memref<1x1x32xf32, #tpu.memory_space<vmem>>, vector<1x1x32xf32>
    %23 = vector.shape_cast %22 : vector<1x1x32xf32> to vector<1x32xf32>
    %24 = vector.broadcast %23 : vector<1x32xf32> to vector<128x32xf32>
    %25 = arith.addf %21, %24 : vector<128x32xf32>
    %cst_23 = arith.constant 0.176776692 : f32
    %26 = vector.broadcast %cst_23 : f32 to vector<128x32xf32>
    %27 = arith.mulf %11, %26 : vector<128x32xf32>
    %28 = arith.truncf %27 : vector<128x32xf32> to vector<128x32xbf16>
    %29 = arith.truncf %18 : vector<128x32xf32> to vector<128x32xbf16>
    %cst_24 = arith.constant dense<0.000000e+00> : vector<128x128xf32>
    %30 = tpu.matmul %28, %29, %cst_24 {dimension_numbers = #tpu.dot_dimension_numbers<[1], [1], [0], [0], [0, 0, 1, 0], [], []>} : vector<128x32xbf16>, vector<128x32xbf16>, vector<128x128xf32> -> vector<128x128xf32>
    %cst_25 = arith.constant dense<0xFF800000> : vector<128xf32>
    %31 = vector.multi_reduction <maximumf>, %30, %cst_25 [1] : vector<128x128xf32> to vector<128xf32>
    %32 = vector.shape_cast %31 : vector<128xf32> to vector<128x1xf32>
    %33 = vector.broadcast %32 : vector<128x1xf32> to vector<128x128xf32>
    %34 = arith.subf %30, %33 : vector<128x128xf32>
    %35 = math.exp %34 : vector<128x128xf32>
    %cst_26 = arith.constant dense<0.000000e+00> : vector<128xf32>
    %36 = vector.multi_reduction <add>, %35, %cst_26 [1] : vector<128x128xf32> to vector<128xf32>
    %37 = vector.shape_cast %36 : vector<128xf32> to vector<128x1xf32>
    %38 = tpu.reciprocal %37 {approx = true} : vector<128x1xf32> -> vector<128x1xf32>
    %39 = vector.broadcast %38 : vector<128x1xf32> to vector<128x128xf32>
    %40 = arith.mulf %35, %39 : vector<128x128xf32>
    %41 = arith.truncf %40 : vector<128x128xf32> to vector<128x128xbf16>
    %42 = arith.truncf %25 : vector<128x32xf32> to vector<128x32xbf16>
    %cst_27 = arith.constant dense<0.000000e+00> : vector<128x32xf32>
    %43 = tpu.matmul %41, %42, %cst_27 {dimension_numbers = #tpu.dot_dimension_numbers<[1], [0], [0], [1], [0, 0, 1, 1], [], []>} : vector<128x128xbf16>, vector<128x32xbf16>, vector<128x32xf32> -> vector<128x32xf32>
    %c0_28 = arith.constant 0 : index
    %c0_29 = arith.constant 0 : index
    %44 = vector.load %arg12[%c0_28, %c0_29] : memref<128x256xf32, #tpu.memory_space<vmem>>, vector<128x256xf32>
    %45 = arith.truncf %43 : vector<128x32xf32> to vector<128x32xbf16>
    %c0_30 = arith.constant 0 : index
    %c0_31 = arith.constant 0 : index
    %c0_32 = arith.constant 0 : index
    %46 = vector.load %arg9[%c0_30, %c0_31, %c0_32] : memref<1x32x256xbf16, #tpu.memory_space<vmem>>, vector<1x32x256xbf16>
    %47 = vector.shape_cast %46 : vector<1x32x256xbf16> to vector<32x256xbf16>
    %cst_33 = arith.constant dense<0.000000e+00> : vector<128x256xf32>
    %48 = tpu.matmul %45, %47, %cst_33 {dimension_numbers = #tpu.dot_dimension_numbers<[1], [0], [0], [1], [0, 0, 1, 1], [], []>} : vector<128x32xbf16>, vector<32x256xbf16>, vector<128x256xf32> -> vector<128x256xf32>
    %49 = arith.addf %44, %48 : vector<128x256xf32>
    %c0_34 = arith.constant 0 : index
    %c0_35 = arith.constant 0 : index
    %50 = vector.load %arg12[%c0_34, %c0_35] : memref<128x256xf32, #tpu.memory_space<vmem>>, vector<128x256xf32>
    tpu.vector_store %arg12[%c0_34, %c0_35], %49 {strides = array<i32>} : memref<128x256xf32, #tpu.memory_space<vmem>>, vector<128x256xf32>,
    %c7_i32 = arith.constant 7 : i32
    %51 = arith.cmpi eq, %arg1, %c7_i32 : i32
    %52 = arith.extui %51 : i1 to i32
    %c0_i32_36 = arith.constant 0 : i32
    %53 = arith.cmpi ne, %52, %c0_i32_36 : i32
    scf.if %53 {
      %c0_37 = arith.constant 0 : index
      %c0_38 = arith.constant 0 : index
      %54 = vector.load %arg12[%c0_37, %c0_38] : memref<128x256xf32, #tpu.memory_space<vmem>>, vector<128x256xf32>
      %c0_39 = arith.constant 0 : index
      %c0_40 = arith.constant 0 : index
      %55 = vector.load %arg10[%c0_39, %c0_40] : memref<1x256xf32, #tpu.memory_space<vmem>>, vector<1x256xf32>
      %56 = vector.broadcast %55 : vector<1x256xf32> to vector<128x256xf32>
      %57 = arith.addf %54, %56 : vector<128x256xf32>
      %c0_41 = arith.constant 0 : index
      %c0_42 = arith.constant 0 : index
      %c0_43 = arith.constant 0 : index
      %58 = vector.load %arg11[%c0_41, %c0_42, %c0_43] : memref<1x128x256xf32, #tpu.memory_space<vmem>>, vector<1x128x256xf32>
      %59 = vector.shape_cast %58 : vector<1x128x256xf32> to vector<128x256xf32>
      %60 = vector.shape_cast %57 : vector<128x256xf32> to vector<1x128x256xf32>
      tpu.vector_store %arg11[%c0_41, %c0_42, %c0_43], %60 {strides = array<i32>} : memref<1x128x256xf32, #tpu.memory_space<vmem>>, vector<1x128x256xf32>,
    } else {
    }
    return
  }
  func.func @transform_0(%arg0: i32, %arg1: i32) -> (i32, i32, i32) {
    %c0_i32 = arith.constant 0 : i32
    %c0_i32_0 = arith.constant 0 : i32
    %c0_i32_1 = arith.constant 0 : i32
    return %arg0, %c0_i32, %c0_i32_0 : i32, i32, i32
  }
  func.func @transform_1(%arg0: i32, %arg1: i32) -> (i32, i32, i32) {
    %c0_i32 = arith.constant 0 : i32
    %c0_i32_0 = arith.constant 0 : i32
    %c0_i32_1 = arith.constant 0 : i32
    return %arg1, %c0_i32, %c0_i32_0 : i32, i32, i32
  }
  func.func @transform_2(%arg0: i32, %arg1: i32) -> (i32, i32, i32) {
    %c0_i32 = arith.constant 0 : i32
    %c0_i32_0 = arith.constant 0 : i32
    %c0_i32_1 = arith.constant 0 : i32
    return %arg1, %c0_i32, %c0_i32_0 : i32, i32, i32
  }
  func.func @transform_3(%arg0: i32, %arg1: i32) -> (i32, i32, i32) {
    %c0_i32 = arith.constant 0 : i32
    %c0_i32_0 = arith.constant 0 : i32
    %c0_i32_1 = arith.constant 0 : i32
    return %arg1, %c0_i32, %c0_i32_0 : i32, i32, i32
  }
  func.func @transform_4(%arg0: i32, %arg1: i32) -> (i32, i32, i32) {
    %c0_i32 = arith.constant 0 : i32
    %c0_i32_0 = arith.constant 0 : i32
    %c0_i32_1 = arith.constant 0 : i32
    return %arg1, %c0_i32, %c0_i32_0 : i32, i32, i32
  }
  func.func @transform_5(%arg0: i32, %arg1: i32) -> (i32, i32, i32) {
    %c0_i32 = arith.constant 0 : i32
    %c0_i32_0 = arith.constant 0 : i32
    %c0_i32_1 = arith.constant 0 : i32
    return %arg1, %c0_i32, %c0_i32_0 : i32, i32, i32
  }
  func.func @transform_6(%arg0: i32, %arg1: i32) -> (i32, i32, i32) {
    %c0_i32 = arith.constant 0 : i32
    %c0_i32_0 = arith.constant 0 : i32
    %c0_i32_1 = arith.constant 0 : i32
    return %arg1, %c0_i32, %c0_i32_0 : i32, i32, i32
  }
  func.func @transform_7(%arg0: i32, %arg1: i32) -> (i32, i32, i32) {
    %c0_i32 = arith.constant 0 : i32
    %c0_i32_0 = arith.constant 0 : i32
    %c0_i32_1 = arith.constant 0 : i32
    return %arg1, %c0_i32, %c0_i32_0 : i32, i32, i32
  }
  func.func @transform_8(%arg0: i32, %arg1: i32) -> (i32, i32) {
    %c0_i32 = arith.constant 0 : i32
    %c0_i32_0 = arith.constant 0 : i32
    %c0_i32_1 = arith.constant 0 : i32
    return %c0_i32, %c0_i32_0 : i32, i32
  }
  func.func @transform_9(%arg0: i32, %arg1: i32) -> (i32, i32, i32) {
    %c0_i32 = arith.constant 0 : i32
    %c0_i32_0 = arith.constant 0 : i32
    %c0_i32_1 = arith.constant 0 : i32
    return %arg0, %c0_i32, %c0_i32_0 : i32, i32, i32
  }
}

</mosaic_0001>

<bundles_post_ra>
// kernel: tpu_custom_call.1
= control target key start
LH: loop header
LB: loop body
LE: loop exit
PB: predicated region body
PF: predicated region fallthrough
CT: control target
= control target key end

     0   :  { %s3591_s0 = inlined_call_operand.vmem [shape: bf16[2,128,256], index: 0, kind: input, shape index: {}]   ;;  %s3592_s1 = inlined_call_operand.vmem [shape: bf16[8,256,32], index: 1, kind: input, shape index: {}]   ;;  %s3593_s2 = inlined_call_operand.vmem [shape: bf16[8,256,32], index: 2, kind: input, shape index: {}]   ;;  %s3594_s3 = inlined_call_operand.vmem [shape: bf16[8,256,32], index: 3, kind: input, shape index: {}]   ;;  %s3595_s4 = inlined_call_operand.vmem [shape: f32[8,1,32], index: 4, kind: input, shape index: {}]   ;;  %s3596_s5 = inlined_call_operand.vmem [shape: f32[8,1,32], index: 5, kind: input, shape index: {}]   ;;  %s3597_s6 = inlined_call_operand.vmem [shape: f32[8,1,32], index: 6, kind: input, shape index: {}]   ;;  %s3598_s7 = inlined_call_operand.vmem [shape: bf16[8,32,256], index: 7, kind: input, shape index: {}]   ;;  %s3599_s8 = inlined_call_operand.vmem [shape: f32[1,256], index: 8, kind: input, shape index: {}]   ;;  %s3600_s9 = inlined_call_operand.hbm [shape: f32[2,128,256], index: 9, kind: output, shape index: {}]  }
   0x1   :  { %3613 = sst [smem:[#allocation20_spill]] %s3591_s0 }
   0x2   :  { %3614 = sst [smem:[#allocation21_spill]] %s3592_s1 }
   0x3   :  { %3615 = sst [smem:[#allocation22_spill]] %s3593_s2 }
   0x4   :  { %3616 = sst [smem:[#allocation23_spill]] %s3600_s9 }
   0x5   :  { %14 = vsyncpa [#allocation4], 0 }
   0x6   :  { %16 = vsyncpa [#allocation4 + $0x1], 0  ;;  %s2846_s30 = smov 0   ;;  %s2848_s10 = smov 0  }
   0x7   :  { %s2850_s11 = smov 0   ;;  %s2852_s12 = smov 0  }
   0x8   :  { %s2854_s13 = smov 0   ;;  %s2856_s14 = smov 0  }
   0x9   :  { %s2858_s15 = smov 0   ;;  %s2860_s16 = smov 0  }
   0xa LB: > { %3617 = sst [smem:[#allocation6_spill]] %s2763_s30  ;;  %s2147_s17 = sadd.s32 4294967295, %s2791_s16   ;;  %s2791_s16 = sphi %s2860_s16, %s22_s16   ;;  %s2787_s15 = sphi %s2858_s15, %s3652_s15   ;;  %s2783_s14 = sphi %s2856_s14, %s3651_s14   ;;  %s2779_s13 = sphi %s2854_s13, %s3650_s13   ;;  %s2775_s12 = sphi %s2852_s12, %s3649_s12   ;;  %s2771_s11 = sphi %s2850_s11, %s3648_s11   ;;  %s2767_s10 = sphi %s2848_s10, %s3654_s10   ;;  %s2763_s30 = sphi %s2846_s30, %s3653_s30  }
   0xb   : > { %3618 = sst [smem:[#allocation7_spill]] %s2771_s11  ;;  %s2148_s18 = sadd.s32 4294967294, %s2791_s16  }
   0xc   : > { %3619 = sst [smem:[#allocation8_spill]] %s2783_s14  ;;  %s31_s19 = sadd.s32 1, %s2783_s14 }
   0xd   : > { %3620 = sst [smem:[#allocation9_spill]] %s2787_s15  ;;  %p32_p0 = scmp.ge.s32.totalorder %s31_s19, 8 }
   0xe   : > { %3621 = sst [smem:[#allocation10_spill]] %s2791_s16  ;;  %s34_s20 = sadd.s32 1, %s2787_s15 }
   0xf   : > { %p280_p1 = scmp.ne.s32.totalorder %s2771_s11, %s2767_s10  ;;  %p281_p2 = scmp.eq.s32.totalorder %s2147_s17, 15 }
  0x10   : > { %s3656_s19 = smov (%p32_p0, %s31_s19), 0  ;;  %s3658_s20 = smov (!%p32_p0, %s34_s20), %s2787_s15 }
  0x11   : > { %3622 = sst [smem:[#allocation11_spill]] %s3656_s19  ;;  %p2895_p3 = por %p281_p2, %p280_p1 }
  0x12   : > { %p286_p4 = scmp.ne.s32.totalorder %s2767_s10, %s2763_s30  ;;  %p36_p5 = scmp.ge.s32.totalorder %s3658_s20, 2 }
  0x13   : > { %s3623_s21 = scalar_select %p2895_p3, 1, 0 }
  0x14   : > { %p287_p6 = scmp.eq.s32.totalorder %s2148_s18, 15  ;;  %p2151_p7 = scmp.ge.s32.totalorder %s2791_s16, 1 }
  0x15   : > { %3624 = sst [smem:[#allocation12_spill]] %s3623_s21  ;;  %p366_p8 = scmp.lt.s32.totalorder %s2791_s16, 17 }
  0x16   : > { %s3660_s20 = smov (%p36_p5, %s3658_s20), 0  ;;  %p2905_p9 = por %p287_p6, %p286_p4 }
  0x17   : > { %3625 = sst [smem:[#allocation13_spill]] %s3660_s20  ;;  %p367_p10 = pnand %p2151_p7, %p366_p8 }
  0x18   : > { %s3626_s22 = scalar_select %p2905_p9, 1, 0 }
  0x19   : > { %s267_s23 = ssub.s32 %s2787_s15, %s3660_s20  ;;  %s270_s24 = sadd.s32 1, %s2771_s11 }
  0x1a   : > { %3627 = sst [smem:[#allocation14_spill]] %s3626_s22  ;;  %p268_p11 = scmp.eq.s32.totalorder %s267_s23, 0 }
  0x1b   : > { %370 = sbr.rel (%p367_p10) target bundleno = 1406 (0x57e), region = 56 }
  0x1c   : > { %s2913_s25 = scalar_select %p268_p11, %s2771_s11, %s270_s24  }
  0x1e   : > { %3628 = sst [smem:[#allocation15_spill]] %s2913_s25 }
  0x20   : > { %s3603_s26 = sand.u32 1, %s2767_s10   ;;  %p431_p12 = scmp.lt.s32.totalorder %s2779_s13, 1 }
  0x21   : > { %s2152_s27 = sshll.u32 %s3603_s26, 8  ;;  %p436_p13 = scmp.lt.s32.totalorder %s2775_s12, 7 }
  0x22   : > { %s432_s28 = scalar_select %p431_p12, %s2779_s13, 1 }
  0x23   : > { %s2922_s29 = scalar_select %p436_p13, %s2775_s12, 7 }
  0x24   : > { %s2466_s17 = sshll.u32 %s432_s28, 7  ;;  %s3629_s0 = sld [smem:[#allocation20_spill]] }
  0x25   : > { %s2467_s20 = sshll.u32 %s2922_s29, 7  ;;  %s3630_s1 = sld [smem:[#allocation21_spill]] }
  0x26   : > { %s3631_s2 = sld [smem:[#allocation22_spill]]  ;;  %s2943_s28 = scalar_lea.vmem %s3594_s3, %s2467_s20 }
  0x27   : > { %s456_s15 = scalar_lea.vmem %s3596_s5, %s2922_s29  ;;  %s459_s9 = scalar_lea.vmem %s3597_s6, %s2922_s29 }
  0x28   : > { %s2470_s14 = sshll.u32 %s2922_s29, 5  ;;  %s2963_s30 = scalar_lea.vmem [#allocation3], %s2152_s27 }
  0x29   : > { %s2961_s21 = scalar_lea.vmem %s3598_s7, %s2470_s14  ;;  %p2163_p0 = scmp.ne.s32.totalorder %s2775_s12, 0 }
  0x2a   : > { %s2927_s24 = scalar_lea.vmem %s3629_s0, %s2466_s17  ;;  %s453_s17 = scalar_lea.vmem %s3595_s4, %s2922_s29 }
  0x2b   : > { %s2933_s26 = scalar_lea.vmem %s3630_s1, %s2467_s20  ;;  %469 = sbr.rel (%p2163_p0) target bundleno = 81 (0x51), region = 60 }
  0x2c   : > { %s2938_s11 = scalar_lea.vmem %s3631_s2, %s2467_s20 }
  0x30   : > { %v2793_v0 = vmov 0.0  }
  0x31   : > { %470 = vst [vmem:[#allocation2 + $0xb0] sm:$0xff] %v2793_v0 }
  0x32   : > { %471 = vst [vmem:[#allocation2] sm:$0xff] %v2793_v0 }
  0x33   : > { %472 = vst [vmem:[#allocation2 + $0xd8] sm:$0xff] %v2793_v0 }
  0x34   : > { %473 = vst [vmem:[#allocation2 + $0x18] sm:$0xff] %v2793_v0 }
  0x35   : > { %474 = vst [vmem:[#allocation2 + $0x50] sm:$0xff] %v2793_v0 }
  0x36   : > { %475 = vst [vmem:[#allocation2 + $0x68] sm:$0xff] %v2793_v0 }
  0x37   : > { %476 = vst [vmem:[#allocation2 + $0x30] sm:$0xff] %v2793_v0 }
  0x38   : > { %477 = vst [vmem:[#allocation2 + $0x48] sm:$0xff] %v2793_v0 }
  0x39   : > { %478 = vst [vmem:[#allocation2 + $0x80] sm:$0xff] %v2793_v0 }
  0x3a   : > { %479 = vst [vmem:[#allocation2 + $0x88] sm:$0xff] %v2793_v0 }
  0x3b   : > { %480 = vst [vmem:[#allocation2 + $0xe8] sm:$0xff] %v2793_v0 }
  0x3c   : > { %481 = vst [vmem:[#allocation2 + $0xb8] sm:$0xff] %v2793_v0 }
  0x3d   : > { %482 = vst [vmem:[#allocation2 + $0x60] sm:$0xff] %v2793_v0 }
  0x3e   : > { %483 = vst [vmem:[#allocation2 + $0xf0] sm:$0xff] %v2793_v0 }
  0x3f   : > { %484 = vst [vmem:[#allocation2 + $0x8] sm:$0xff] %v2793_v0 }
  0x40   : > { %485 = vst [vmem:[#allocation2 + $0x78] sm:$0xff] %v2793_v0 }
  0x41   : > { %486 = vst [vmem:[#allocation2 + $0x38] sm:$0xff] %v2793_v0 }
  0x42   : > { %487 = vst [vmem:[#allocation2 + $0x58] sm:$0xff] %v2793_v0 }
  0x43   : > { %488 = vst [vmem:[#allocation2 + $0x40] sm:$0xff] %v2793_v0 }
  0x44   : > { %489 = vst [vmem:[#allocation2 + $0xc8] sm:$0xff] %v2793_v0 }
  0x45   : > { %490 = vst [vmem:[#allocation2 + $0xe0] sm:$0xff] %v2793_v0 }
  0x46   : > { %491 = vst [vmem:[#allocation2 + $0x90] sm:$0xff] %v2793_v0 }
  0x47   : > { %492 = vst [vmem:[#allocation2 + $0x70] sm:$0xff] %v2793_v0 }
  0x48   : > { %493 = vst [vmem:[#allocation2 + $0xc0] sm:$0xff] %v2793_v0 }
  0x49   : > { %494 = vst [vmem:[#allocation2 + $0xa8] sm:$0xff] %v2793_v0 }
  0x4a   : > { %495 = vst [vmem:[#allocation2 + $0xd0] sm:$0xff] %v2793_v0 }
  0x4b   : > { %496 = vst [vmem:[#allocation2 + $0x10] sm:$0xff] %v2793_v0 }
  0x4c   : > { %497 = vst [vmem:[#allocation2 + $0x28] sm:$0xff] %v2793_v0 }
  0x4d   : > { %498 = vst [vmem:[#allocation2 + $0xa0] sm:$0xff] %v2793_v0 }
  0x4e   : > { %499 = vst [vmem:[#allocation2 + $0xf8] sm:$0xff] %v2793_v0 }
  0x4f   : > { %500 = vst [vmem:[#allocation2 + $0x20] sm:$0xff] %v2793_v0 }
  0x50   : > { %501 = vst [vmem:[#allocation2 + $0x98] sm:$0xff] %v2793_v0 }
  0x51 PF: > { %v2494_v1 = vld [vmem:[%s2933_s26 + $0x38] sm:$0xff]  ;;  %v2493_v3 = vld [vmem:[%s2933_s26 + $0x30] sm:$0xff]  ;;  %v2492_v5 = vld [vmem:[%s2933_s26 + $0x28] sm:$0xff]  ;;  %vm1320_vm0 = vcmask 261120   ;;  %p2460_p1 = scmp.ne.s32.totalorder %s2775_s12, 7 }
  0x52   : > { %v2502_v2 = vld [vmem:[%s2933_s26 + $0x78] sm:$0xff]  ;;  %2540 = vmatpush.bf16.msra.mxu2 %v2494_v1  ;;  %v2501_v4 = vld [vmem:[%s2933_s26 + $0x70] sm:$0xff]  ;;  %730 = vmatpush.bf16.msra.mxu0 %v2494_v1  ;;  %v2500_v6 = vld [vmem:[%s2933_s26 + $0x68] sm:$0xff] }
  0x53   : > { %2548 = vmatpush.bf16.msra.mxu3 %v2502_v2  ;;  %779 = vmatpush.bf16.msra.mxu1 %v2502_v2  ;;  %v2491_v7 = vld [vmem:[%s2933_s26 + $0x20] sm:$0xff]  ;;  %v2490_v9 = vld [vmem:[%s2933_s26 + $0x18] sm:$0xff]  ;;  %v2489_v11 = vld [vmem:[%s2933_s26 + $0x10] sm:$0xff] }
  0x54   : > { %v2499_v8 = vld [vmem:[%s2933_s26 + $0x60] sm:$0xff]  ;;  %v2498_v10 = vld [vmem:[%s2933_s26 + $0x58] sm:$0xff]  ;;  %v2497_v12 = vld [vmem:[%s2933_s26 + $0x50] sm:$0xff] }
  0x55   : > { %v2488_v13 = vld [vmem:[%s2933_s26 + $0x8] sm:$0xff]  ;;  %v2487_v15 = vld [vmem:[%s2933_s26] sm:$0xff]  ;;  %v2510_v23 = vld [vmem:[%s2938_s11 + $0x38] sm:$0xff] }
  0x56   : > { %2541 = vmatpush.bf16.msra.mxu2 %v2493_v3  ;;  %731 = vmatpush.bf16.msra.mxu0 %v2493_v3  ;;  %v2496_v14 = vld [vmem:[%s2933_s26 + $0x48] sm:$0xff]  ;;  %v2495_v16 = vld [vmem:[%s2933_s26 + $0x40] sm:$0xff]  ;;  %v2518_v24 = vld [vmem:[%s2938_s11 + $0x78] sm:$0xff] }
  0x57   : > { %2549 = vmatpush.bf16.msra.mxu3 %v2501_v4  ;;  %780 = vmatpush.bf16.msra.mxu1 %v2501_v4  ;;  %v2198_v17 = vld [vmem:[%s2927_s24 + $0x40] sm:$0xf]  ;;  %v2480_v18 = vld [vmem:[%s2927_s24 + $0x44] sm:$0xf0]  ;;  %v2479_v19 = vld [vmem:[%s2927_s24 + $0x44] sm:$0xf] }
  0x58   : > { %v2200_v20 = vld [vmem:[%s2927_s24 + $0x48] sm:$0xf0]  ;;  %v2986_v21 = vor.u32 %v2480_v18, %v2198_v17  ;;  %v2509_v25 = vld [vmem:[%s2938_s11 + $0x30] sm:$0xff]  ;;  %v2482_v30 = vld [vmem:[%s2927_s24 + $0x54] sm:$0xf0] }
  0x59   : > { %v2988_v22 = vor.u32 %v2479_v19, %v2200_v20  ;;  %v2517_v26 = vld [vmem:[%s2938_s11 + $0x70] sm:$0xff]  ;;  %v2508_v27 = vld [vmem:[%s2938_s11 + $0x28] sm:$0xff]  ;;  %v2208_v32 = vld [vmem:[%s2927_s24 + $0x58] sm:$0xf0] }
  0x5a   : > { %2542 = vmatpush.bf16.msra.mxu2 %v2492_v5  ;;  %732 = vmatpush.bf16.msra.mxu0 %v2492_v5  ;;  %v2516_v28 = vld [vmem:[%s2938_s11 + $0x68] sm:$0xff]  ;;  %v2206_v29 = vld [vmem:[%s2927_s24 + $0x50] sm:$0xf]  ;;  %v2481_v31 = vld [vmem:[%s2927_s24 + $0x54] sm:$0xf] }
  0x5b   : > { %2550 = vmatpush.bf16.msra.mxu3 %v2500_v6  ;;  %781 = vmatpush.bf16.msra.mxu1 %v2500_v6  ;;  %v2507_v33 = vld [vmem:[%s2938_s11 + $0x20] sm:$0xff]  ;;  %v3004_v35 = vor.u32 %v2482_v30, %v2206_v29  ;;  %v3006_v36 = vor.u32 %v2481_v31, %v2208_v32  ;;  %v2506_v37 = vld [vmem:[%s2938_s11 + $0x18] sm:$0xff]  ;;  %v2505_v39 = vld [vmem:[%s2938_s11 + $0x10] sm:$0xff] }
  0x5c   : > { %v2515_v34 = vld [vmem:[%s2938_s11 + $0x60] sm:$0xff]  ;;  %v2514_v38 = vld [vmem:[%s2938_s11 + $0x58] sm:$0xff]  ;;  %v2513_v40 = vld [vmem:[%s2938_s11 + $0x50] sm:$0xff] }
  0x5d   : > { %v2166_v41 = vld [vmem:[%s2927_s24] sm:$0xf]  ;;  %v2472_v42 = vld [vmem:[%s2927_s24 + $0x4] sm:$0xf0]  ;;  %v2483_v48 = vld [vmem:[%s2927_s24 + $0x64] sm:$0xf] }
  0x5e   : > { %2543 = vmatpush.bf16.msra.mxu2 %v2491_v7  ;;  %733 = vmatpush.bf16.msra.mxu0 %v2491_v7  ;;  %v3016_v43 = vor.u32 %v2472_v42, %v2166_v41  ;;  %v2504_v44 = vld [vmem:[%s2938_s11 + $0x8] sm:$0xff]  ;;  %v2214_v46 = vld [vmem:[%s2927_s24 + $0x60] sm:$0xf]  ;;  %v2471_v54 = vld [vmem:[%s2927_s24 + $0x4] sm:$0xf] }
  0x5f   : > { %2551 = vmatpush.bf16.msra.mxu3 %v2499_v8  ;;  %782 = vmatpush.bf16.msra.mxu1 %v2499_v8  ;;  %v2512_v45 = vld [vmem:[%s2938_s11 + $0x48] sm:$0xff]  ;;  %v2503_v50 = vld [vmem:[%s2938_s11] sm:$0xff]  ;;  %v2174_v57 = vld [vmem:[%s2927_s24 + $0x10] sm:$0xf] }
  0x60   : > { %v2484_v47 = vld [vmem:[%s2927_s24 + $0x64] sm:$0xf0]  ;;  %v2216_v49 = vld [vmem:[%s2927_s24 + $0x68] sm:$0xf0]  ;;  %v2511_v51 = vld [vmem:[%s2938_s11 + $0x40] sm:$0xff] }
  0x61   : > { %v3027_v52 = vor.u32 %v2484_v47, %v2214_v46  ;;  %v3029_v53 = vor.u32 %v2483_v48, %v2216_v49  ;;  %v2168_v55 = vld [vmem:[%s2927_s24 + $0x8] sm:$0xf0]  ;;  %v2474_v58 = vld [vmem:[%s2927_s24 + $0x14] sm:$0xf0]  ;;  %v2222_v60 = vld [vmem:[%s2927_s24 + $0x70] sm:$0xf] }
  0x62   : > { %2544 = vmatpush.bf16.msra.mxu2 %v2490_v9  ;;  %734 = vmatpush.bf16.msra.mxu0 %v2490_v9  ;;  %v3033_v56 = vor.u32 %v2471_v54, %v2168_v55  ;;  %v3040_v59 = vor.u32 %v2474_v58, %v2174_v57  ;;  %v2486_v61 = vld [vmem:[%s2927_s24 + $0x74] sm:$0xf0]  ;;  %v2485_v62 = vld [vmem:[%s2927_s24 + $0x74] sm:$0xf]  ;;  %v2224_v63 = vld [vmem:[%s2927_s24 + $0x78] sm:$0xf0] }
  0x63   : > { %2552 = vmatpush.bf16.msra.mxu3 %v2498_v10  ;;  %783 = vmatpush.bf16.msra.mxu1 %v2498_v10  ;;  %v3047_v0 = vor.u32 %v2486_v61, %v2222_v60  ;;  %v3049_v1 = vor.u32 %v2485_v62, %v2224_v63  ;;  %v2473_v2 = vld [vmem:[%s2927_s24 + $0x14] sm:$0xf]  ;;  %v2176_v3 = vld [vmem:[%s2927_s24 + $0x18] sm:$0xf0]  ;;  %v2182_v5 = vld [vmem:[%s2927_s24 + $0x20] sm:$0xf] }
  0x64   : > { %v3053_v4 = vor.u32 %v2473_v2, %v2176_v3  ;;  %v2476_v6 = vld [vmem:[%s2927_s24 + $0x24] sm:$0xf0]  ;;  %v2475_v8 = vld [vmem:[%s2927_s24 + $0x24] sm:$0xf]  ;;  %v2184_v9 = vld [vmem:[%s2927_s24 + $0x28] sm:$0xf0] }
  0x65   : > { %v3060_v7 = vor.u32 %v2476_v6, %v2182_v5  ;;  %v3065_v10 = vor.u32 %v2475_v8, %v2184_v9  ;;  %v3093_v17 = vld [vmem:[%s453_s17] ss:$0 sm:$0xff] }
  0x66   : > { %2545 = vmatpush.bf16.msra.mxu2 %v2489_v11  ;;  %735 = vmatpush.bf16.msra.mxu0 %v2489_v11  ;;  %v2190_v11 = vld [vmem:[%s2927_s24 + $0x30] sm:$0xf]  ;;  %v3134_v47 = vld [vmem:[%s456_s15] ss:$0 sm:$0xff] }
  0x67   : > { %2553 = vmatpush.bf16.msra.mxu3 %v2497_v12  ;;  %784 = vmatpush.bf16.msra.mxu1 %v2497_v12  ;;  %v2478_v12 = vld [vmem:[%s2927_s24 + $0x34] sm:$0xf0] }
  0x6a   : > { %2546 = vmatpush.bf16.msra.mxu2 %v2488_v13  ;;  %736 = vmatpush.bf16.msra.mxu0 %v2488_v13  ;;  %v3072_v13 = vor.u32 %v2478_v12, %v2190_v11 }
  0x6b   : > { %2554 = vmatpush.bf16.msra.mxu3 %v2496_v14  ;;  %785 = vmatpush.bf16.msra.mxu1 %v2496_v14  ;;  %v2477_v14 = vld [vmem:[%s2927_s24 + $0x34] sm:$0xf] }
  0x6e   : > { %2547 = vmatpush.bf16.msra.mxu2 %v2487_v15  ;;  %737 = vmatpush.bf16.msra.mxu0 %v2487_v15  ;;  %v2192_v15 = vld [vmem:[%s2927_s24 + $0x38] sm:$0xf0] }
  0x6f   : > { %2555 = vmatpush.bf16.msra.mxu3 %v2495_v16  ;;  %786 = vmatpush.bf16.msra.mxu1 %v2495_v16  ;;  %v3077_v16 = vor.u32 %v2477_v14, %v2192_v15 }
  0x71   : > { %758 = vmatmul.bf16.vlgmr.msra.gmra.mxu2 %v2986_v21  ;;  %738 = vmatmul.bf16.vlgmr.msra.gmra.mxu0 %v3016_v43 }
  0x72   : > { %807 = vmatmul.bf16.vlgmr.msra.gmra.mxu3 %v2988_v22  ;;  %960 = vmatpush.bf16.msrb.mxu2 %v2510_v23 }
  0x73   : > { %1009 = vmatpush.bf16.msrb.mxu3 %v2518_v24  ;;  %787 = vmatmul.bf16.vlgmr.msra.gmra.mxu1 %v3033_v56 }
  0x76   : > { %961 = vmatpush.bf16.msrb.mxu2 %v2509_v25 }
  0x77   : > { %1010 = vmatpush.bf16.msrb.mxu3 %v2517_v26 }
  0x7a   : > { %962 = vmatpush.bf16.msrb.mxu2 %v2508_v27 }
  0x7b   : > { %1011 = vmatpush.bf16.msrb.mxu3 %v2516_v28 }
  0x7e   : > { %963 = vmatpush.bf16.msrb.mxu2 %v2507_v33 }
  0x7f   : > { %1012 = vmatpush.bf16.msrb.mxu3 %v2515_v34 }
  0x81   : > { %763 = vmatmul.bf16.gmra.mxu2 %v3004_v35  ;;  %743 = vmatmul.bf16.gmra.mxu0 %v3040_v59 }
  0x82   : > { %812 = vmatmul.bf16.gmra.mxu3 %v3006_v36  ;;  %964 = vmatpush.bf16.msrb.mxu2 %v2506_v37 }
  0x83   : > { %1013 = vmatpush.bf16.msrb.mxu3 %v2514_v38  ;;  %792 = vmatmul.bf16.gmra.mxu1 %v3053_v4 }
  0x86   : > { %965 = vmatpush.bf16.msrb.mxu2 %v2505_v39 }
  0x87   : > { %1014 = vmatpush.bf16.msrb.mxu3 %v2513_v40 }
  0x8a   : > { %966 = vmatpush.bf16.msrb.mxu2 %v2504_v44 }
  0x8b   : > { %1015 = vmatpush.bf16.msrb.mxu3 %v2512_v45 }
  0x8e   : > { %967 = vmatpush.bf16.msrb.mxu2 %v2503_v50 }
  0x8f   : > { %1016 = vmatpush.bf16.msrb.mxu3 %v2511_v51 }
  0x91   : > { %768 = vmatmul.bf16.gmra.mxu2 %v3027_v52  ;;  %748 = vmatmul.bf16.gmra.mxu0 %v3060_v7 }
  0x92   : > { %817 = vmatmul.bf16.gmra.mxu3 %v3029_v53 }
  0x93   : > { %797 = vmatmul.bf16.gmra.mxu1 %v3065_v10 }
  0xa1   : > { %773 = vmatmul.bf16.gmra.mxu2 %v3047_v0  ;;  %753 = vmatmul.bf16.gmra.mxu0 %v3072_v13 }
  0xa2   : > { %822 = vmatmul.bf16.gmra.mxu3 %v3049_v1 }
  0xa3   : > { %802 = vmatmul.bf16.gmra.mxu1 %v3077_v16 }
  0xb1   : > { %968 = vmatmul.bf16.vlgmr.msrb.gmra.mxu2 %v3016_v43 }
  0xb2   : > { %1017 = vmatmul.bf16.vlgmr.msrb.gmra.mxu3 %v3033_v56 }
  0xc1   : > { %973 = vmatmul.bf16.gmra.mxu2 %v3040_v59 }
  0xc2   : > { %1022 = vmatmul.bf16.gmra.mxu3 %v3053_v4 }
  0xd1   : > { %978 = vmatmul.bf16.gmra.mxu2 %v3060_v7 }
  0xd2   : > { %1027 = vmatmul.bf16.gmra.mxu3 %v3065_v10 }
  0xe1   : > { %983 = vmatmul.bf16.gmra.mxu2 %v3072_v13 }
  0xe2   : > { %1032 = vmatmul.bf16.gmra.mxu3 %v3077_v16 }
  0xf1   : > { %988 = vmatmul.bf16.gmra.mxu2 %v2986_v21 }
  0xf2   : > { %1037 = vmatmul.bf16.gmra.mxu3 %v2988_v22 }
  0xf4   : > { %v759_v18 = vpop.f32.mrf.mxu2 }
  0xf5   : > { %v808_v19 = vpop.f32.mrf.mxu3  ;;  %v760_v20 = vadd.f32 %v3093_v17, %v759_v18 }
  0xf7   : > { %v3096_v23 = vadd.f32 %v808_v19, %v760_v20 }
  0xfc   : > { %v3098_v24 = vpop.f32.mrf.mxu2 }
  0xfd   : > { %v3100_v25 = vpop.f32.mrf.mxu3 }
 0x101   : > { %993 = vmatmul.bf16.gmra.mxu2 %v3004_v35 }
 0x102   : > { %1042 = vmatmul.bf16.gmra.mxu3 %v3006_v36 }
 0x104   : > { %v764_v26 = vpop.f32.mrf.mxu2 }
 0x105   : > { %v813_v27 = vpop.f32.mrf.mxu3  ;;  %v765_v28 = vadd.f32 %v3093_v17, %v764_v26 }
 0x107   : > { %v3105_v29 = vadd.f32 %v813_v27, %v765_v28 }
 0x10c   : > { %v3107_v30 = vpop.f32.mrf.mxu2 }
 0x10d   : > { %v3109_v31 = vpop.f32.mrf.mxu3 }
 0x111   : > { %998 = vmatmul.bf16.gmra.mxu2 %v3027_v52 }
 0x112   : > { %1047 = vmatmul.bf16.gmra.mxu3 %v3029_v53 }
 0x114   : > { %v769_v32 = vpop.f32.mrf.mxu2 }
 0x115   : > { %v818_v33 = vpop.f32.mrf.mxu3  ;;  %v770_v34 = vadd.f32 %v3093_v17, %v769_v32 }
 0x117   : > { %v3114_v37 = vadd.f32 %v818_v33, %v770_v34 }
 0x119   : > { %3632 = vst [vmem:[#allocation16_spill] sm:$0xff] %v3114_v37 }
 0x11c   : > { %v3116_v38 = vpop.f32.mrf.mxu2 }
 0x11d   : > { %v3118_v39 = vpop.f32.mrf.mxu3 }
 0x121   : > { %1003 = vmatmul.bf16.gmra.mxu2 %v3047_v0 }
 0x122   : > { %1052 = vmatmul.bf16.gmra.mxu3 %v3049_v1 }
 0x124   : > { %v774_v40 = vpop.f32.mrf.mxu2 }
 0x125   : > { %v823_v41 = vpop.f32.mrf.mxu3  ;;  %v775_v42 = vadd.f32 %v3093_v17, %v774_v40 }
 0x127   : > { %v3123_v44 = vadd.f32 %v823_v41, %v775_v42 }
 0x129   : > { %3633 = vst [vmem:[#allocation17_spill] sm:$0xff] %v3123_v44 }
 0x12c   : > { %v3125_v45 = vpop.f32.mrf.mxu2 }
 0x12d   : > { %3634 = vst [vmem:[#allocation18_spill] sm:$0xff] %v3125_v45  ;;  %v3127_v46 = vpop.f32.mrf.mxu3 }
 0x12e   : > { %3635 = vst [vmem:[#allocation19_spill] sm:$0xff] %v3127_v46 }
 0x134   : > { %v969_v48 = vpop.f32.mrf.mxu2 }
 0x135   : > { %v1018_v49 = vpop.f32.mrf.mxu3  ;;  %v970_v50 = vadd.f32 %v3134_v47, %v969_v48 }
 0x137   : > { %v3137_v51 = vadd.f32 %v1018_v49, %v970_v50 }
 0x13c   : > { %v3139_v54 = vpop.f32.mrf.mxu2 }
 0x13d   : > { %v3141_v55 = vpop.f32.mrf.mxu3 }
 0x144   : > { %v974_v57 = vpop.f32.mrf.mxu2 }
 0x145   : > { %v1023_v58 = vpop.f32.mrf.mxu3  ;;  %v975_v60 = vadd.f32 %v3134_v47, %v974_v57 }
 0x147   : > { %v3144_v61 = vadd.f32 %v1023_v58, %v975_v60 }
 0x14c   : > { %v3146_v62 = vpop.f32.mrf.mxu2 }
 0x14d   : > { %v3148_v63 = vpop.f32.mrf.mxu3 }
 0x154   : > { %v979_v2 = vpop.f32.mrf.mxu2 }
 0x155   : > { %v1028_v3 = vpop.f32.mrf.mxu3  ;;  %v980_v5 = vadd.f32 %v3134_v47, %v979_v2 }
 0x157   : > { %v3151_v6 = vadd.f32 %v1028_v3, %v980_v5 }
 0x15c   : > { %v3153_v8 = vpop.f32.mrf.mxu2 }
 0x15d   : > { %v3155_v9 = vpop.f32.mrf.mxu3 }
 0x164   : > { %v984_v11 = vpop.f32.mrf.mxu2 }
 0x165   : > { %v1033_v12 = vpop.f32.mrf.mxu3  ;;  %v985_v14 = vadd.f32 %v3134_v47, %v984_v11 }
 0x167   : > { %v3158_v15 = vadd.f32 %v1033_v12, %v985_v14  ;;  %v2526_v14 = vld [vmem:[%s2943_s28 + $0x38] sm:$0xff] }
 0x168   : > { %1190 = vmatpush.bf16.msrb.mxu0 %v2526_v14  ;;  %v2524_v14 = vld [vmem:[%s2943_s28 + $0x28] sm:$0xff] }
 0x16c   : > { %v3160_v18 = vpop.f32.mrf.mxu2 }
 0x16d   : > { %v3162_v19 = vpop.f32.mrf.mxu3 }
 0x174   : > { %v989_v20 = vpop.f32.mrf.mxu2 }
 0x175   : > { %v1038_v26 = vpop.f32.mrf.mxu3  ;;  %v990_v27 = vadd.f32 %v3134_v47, %v989_v20  ;;  %v2534_v20 = vld [vmem:[%s2943_s28 + $0x78] sm:$0xff] }
 0x176   : > { %1239 = vmatpush.bf16.msrb.mxu1 %v2534_v20  ;;  %v2532_v20 = vld [vmem:[%s2943_s28 + $0x68] sm:$0xff] }
 0x177   : > { %v3165_v28 = vadd.f32 %v1038_v26, %v990_v27 }
 0x17c   : > { %v991_v32 = vpop.f32.mrf.mxu2 }
 0x17d   : > { %v1040_v33 = vpop.f32.mrf.mxu3  ;;  %v992_v34 = vadd.f32 %v3134_v47, %v991_v32  ;;  %v2525_v32 = vld [vmem:[%s2943_s28 + $0x30] sm:$0xff] }
 0x17e   : > { %1191 = vmatpush.bf16.msrb.mxu0 %v2525_v32  ;;  %v2519_v32 = vld [vmem:[%s2943_s28] sm:$0xff] }
 0x17f   : > { %v3168_v40 = vadd.f32 %v1040_v33, %v992_v34  ;;  %v2533_v33 = vld [vmem:[%s2943_s28 + $0x70] sm:$0xff] }
 0x180   : > { %1240 = vmatpush.bf16.msrb.mxu1 %v2533_v33  ;;  %v2527_v33 = vld [vmem:[%s2943_s28 + $0x40] sm:$0xff] }
 0x182   : > { %1192 = vmatpush.bf16.msrb.mxu0 %v2524_v14  ;;  %v739_v14 = vpop.f32.mrf.mxu0 }
 0x184   : > { %v994_v42 = vpop.f32.mrf.mxu2  ;;  %1241 = vmatpush.bf16.msrb.mxu1 %v2532_v20  ;;  %v982_v20 = vadd.f32 %v3134_v47, %v3153_v8  ;;  %v972_v8 = vadd.f32 %v3134_v47, %v3139_v54 }
 0x185   : > { %v1043_v48 = vpop.f32.mrf.mxu3 }
 0x18c   : > { %v996_v49 = vpop.f32.mrf.mxu2 }
 0x18d   : > { %v1045_v50 = vpop.f32.mrf.mxu3 }
 0x194   : > { %v999_v57 = vpop.f32.mrf.mxu2 }
 0x195   : > { %v1048_v58 = vpop.f32.mrf.mxu3 }
 0x19c   : > { %v1001_v60 = vpop.f32.mrf.mxu2 }
 0x19d   : > { %v1050_v2 = vpop.f32.mrf.mxu3  ;;  %v1002_v34 = vadd.f32 %v3134_v47, %v1001_v60  ;;  %v2523_v60 = vld [vmem:[%s2943_s28 + $0x20] sm:$0xff] }
 0x19e   : > { %1193 = vmatpush.bf16.msrb.mxu0 %v2523_v60  ;;  %v788_v60 = vpop.f32.mrf.mxu1 }
 0x1a4   : > { %v1004_v3 = vpop.f32.mrf.mxu2 }
 0x1a5   : > { %v1053_v5 = vpop.f32.mrf.mxu3  ;;  %v1005_v11 = vadd.f32 %v3134_v47, %v1004_v3  ;;  %v1000_v3 = vadd.f32 %v3134_v47, %v999_v57  ;;  %v995_v57 = vadd.f32 %v3134_v47, %v994_v42 }
 0x1a7   : > { %v1054_v41 = vadd.f32 %v1053_v5, %v1005_v11  ;;  %v1049_v37 = vadd.f32 %v1048_v58, %v1000_v3  ;;  %v2531_v5 = vld [vmem:[%s2943_s28 + $0x60] sm:$0xff]  ;;  %v2522_v58 = vld [vmem:[%s2943_s28 + $0x18] sm:$0xff]  ;;  %v1044_v11 = vadd.f32 %v1043_v48, %v995_v57  ;;  %v3636_v3 = vpack.c.bf16 %v3168_v40, %v3165_v28  ;;  %v741_v28 = vpop.f32.mrf.mxu0 }
 0x1a8   : > { %1242 = vmatpush.bf16.msrb.mxu1 %v2531_v5  ;;  %1194 = vmatpush.bf16.msrb.mxu0 %v2522_v58  ;;  %v1031_v5 = vadd.f32 %v3155_v9, %v982_v20  ;;  %v977_v40 = vadd.f32 %v3134_v47, %v3146_v62  ;;  %v1021_v62 = vadd.f32 %v3141_v55, %v972_v8  ;;  %v1296_v8 = vmul.f32 0.17677669, %v3096_v23 }
 0x1ac   : > { %v1006_v12 = vpop.f32.mrf.mxu2 }
 0x1ad   : > { %v1007_v26 = vadd.f32 %v3134_v47, %v1006_v12  ;;  %v1055_v27 = vpop.f32.mrf.mxu3  ;;  %v1051_v12 = vadd.f32 %v1050_v2, %v1002_v34  ;;  %v2530_v2 = vld [vmem:[%s2943_s28 + $0x58] sm:$0xff]  ;;  %v987_v34 = vadd.f32 %v3134_v47, %v3160_v18 }
 0x1ae   : > { %1243 = vmatpush.bf16.msrb.mxu1 %v2530_v2 }
 0x1af   : > { %v1056_v44 = vadd.f32 %v1055_v27, %v1007_v26  ;;  %v2521_v26 = vld [vmem:[%s2943_s28 + $0x10] sm:$0xff]  ;;  %v2528_v27 = vld [vmem:[%s2943_s28 + $0x48] sm:$0xff]  ;;  %v1036_v48 = vadd.f32 %v3162_v19, %v987_v34 }
 0x1b0   : > { %1195 = vmatpush.bf16.msrb.mxu0 %v2521_v26 }
 0x1b1   : > { %v1319_v46 = vpack.c.bf16 %v1056_v44, %v1054_v41  ;;  %v997_v44 = vadd.f32 %v3134_v47, %v996_v49  ;;  %v1318_v41 = vpack.c.bf16 %v1051_v12, %v1049_v37  ;;  %v2529_v49 = vld [vmem:[%s2943_s28 + $0x50] sm:$0xff]  ;;  %v1358_v12 = vsel %vm1320_vm0, %v3636_v3, 0 }
 0x1b2   : > { %1244 = vmatpush.bf16.msrb.mxu1 %v2529_v49  ;;  %v1315_v18 = vpack.c.bf16 %v1036_v48, %v3158_v15  ;;  %v744_v15 = vpop.f32.mrf.mxu0 }
 0x1b3   : > { %v1367_v45 = vsel %vm1320_vm0, %v1319_v46, 0  ;;  %v1364_v46 = vsel %vm1320_vm0, %v1318_v41, 0  ;;  %v745_v26 = vadd.f32 %v3093_v17, %v744_v15 }
 0x1b4   : > { %1369 = vmatpush.bf16.xpose.msra.mxu2 %v1367_v45  ;;  %v1046_v45 = vadd.f32 %v1045_v50, %v997_v44  ;;  %v2520_v50 = vld [vmem:[%s2943_s28 + $0x8] sm:$0xff]  ;;  %v1355_v19 = vsel %vm1320_vm0, %v1315_v18, 0  ;;  %v1314_v44 = vpack.c.bf16 %v1031_v5, %v3151_v6 }
 0x1b5   : > { %1196 = vmatpush.bf16.msrb.mxu0 %v2520_v50 }
 0x1b6   : > { %v1317_v37 = vpack.c.bf16 %v1046_v45, %v1044_v11  ;;  %1245 = vmatpush.bf16.msrb.mxu1 %v2528_v27  ;;  %v1352_v41 = vsel %vm1320_vm0, %v1314_v44, 0  ;;  %v742_v45 = vadd.f32 %v3093_v17, %v741_v28 }
 0x1b8   : > { %v1361_v42 = vsel %vm1320_vm0, %v1317_v37, 0 }
 0x1b9   : > { %1197 = vmatpush.bf16.msrb.mxu0 %v2519_v32 }
 0x1ba   : > { %1246 = vmatpush.bf16.msrb.mxu1 %v2527_v33  ;;  %v746_v58 = vpop.f32.mrf.mxu0 }
 0x1bc   : > { %1370 = vmatpush.bf16.xpose.msra.mxu2 %v1364_v46  ;;  %1198 = vmatmul.bf16.vlgmr.msrb.gmra.mxu0 %v3016_v43  ;;  %v790_v43 = vpop.f32.mrf.mxu1 }
 0x1bd   : > { %1247 = vmatmul.bf16.vlgmr.msrb.gmra.mxu1 %v3033_v56  ;;  %v1026_v56 = vadd.f32 %v3148_v63, %v977_v40  ;;  %v740_v63 = vadd.f32 %v3093_v17, %v739_v14 }
 0x1bf   : > { %v1313_v9 = vpack.c.bf16 %v1026_v56, %v3144_v61  ;;  %v789_v46 = vadd.f32 %v788_v60, %v740_v63 }
 0x1c1   : > { %v1349_v6 = vsel %vm1320_vm0, %v1313_v9, 0  ;;  %v1288_v54 = vmul.f32 0.17677669, %v789_v46 }
 0x1c2   : > { %v749_v11 = vpop.f32.mrf.mxu0 }
 0x1c3   : > { %v750_v33 = vadd.f32 %v3093_v17, %v749_v11 }
 0x1c4   : > { %1371 = vmatpush.bf16.xpose.msra.mxu2 %v1361_v42  ;;  %v793_v57 = vpop.f32.mrf.mxu1 }
 0x1c5   : > { %v794_v37 = vadd.f32 %v793_v57, %v745_v26 }
 0x1c7   : > { %v1290_v50 = vmul.f32 0.17677669, %v794_v37 }
 0x1cc   : > { %1372 = vmatpush.bf16.xpose.msra.mxu2 %v1358_v12  ;;  %1203 = vmatmul.bf16.gmra.mxu0 %v3040_v59  ;;  %v1312_v59 = vpack.c.bf16 %v1021_v62, %v3137_v51  ;;  %v795_v55 = vpop.f32.mrf.mxu1  ;;  %v747_v51 = vadd.f32 %v3093_v17, %v746_v58  ;;  %v3637_v62 = vld [vmem:[#allocation16_spill] sm:$0xff] }
 0x1cd   : > { %1252 = vmatmul.bf16.gmra.mxu1 %v3053_v4  ;;  %v791_v4 = vadd.f32 %v790_v43, %v742_v45 }
 0x1ce   : > { %v1346_v47 = vsel %vm1320_vm0, %v1312_v59, 0  ;;  %v796_v42 = vadd.f32 %v795_v55, %v747_v51  ;;  %v3639_v59 = vld [vmem:[#allocation19_spill] sm:$0xff]  ;;  %v3640_v55 = vld [vmem:[#allocation17_spill] sm:$0xff] }
 0x1cf   : > { %v1289_v61 = vmul.f32 0.17677669, %v791_v4 }
 0x1d0   : > { %v1291_v27 = vmul.f32 0.17677669, %v796_v42 }
 0x1d1   : > { %v1304_v2 = vpack.c.bf16 %v1289_v61, %v1288_v54 }
 0x1d4   : > { %1373 = vmatpush.bf16.xpose.msra.mxu2 %v1355_v19  ;;  %v798_v49 = vpop.f32.mrf.mxu1 }
 0x1d5   : > { %v799_v3 = vadd.f32 %v798_v49, %v750_v33 }
 0x1d7   : > { %v1292_v20 = vmul.f32 0.17677669, %v799_v3 }
 0x1dc   : > { %1374 = vmatpush.bf16.xpose.msra.mxu2 %v1352_v41  ;;  %1208 = vmatmul.bf16.gmra.mxu0 %v3060_v7  ;;  %v751_v7 = vpop.f32.mrf.mxu0  ;;  %v800_v32 = vpop.f32.mrf.mxu1 }
 0x1dd   : > { %1257 = vmatmul.bf16.gmra.mxu1 %v3065_v10  ;;  %v1305_v10 = vpack.c.bf16 %v1291_v27, %v1290_v50  ;;  %v752_v34 = vadd.f32 %v3093_v17, %v751_v7 }
 0x1df   : > { %v801_v12 = vadd.f32 %v800_v32, %v752_v34 }
 0x1e1   : > { %v1293_v18 = vmul.f32 0.17677669, %v801_v12 }
 0x1e4   : > { %1375 = vmatpush.bf16.xpose.msra.mxu2 %v1349_v6  ;;  %v754_v48 = vpop.f32.mrf.mxu0  ;;  %v803_v14 = vpop.f32.mrf.mxu1  ;;  %v1300_v6 = vmul.f32 0.17677669, %v3637_v62 }
 0x1e5   : > { %v755_v60 = vadd.f32 %v3093_v17, %v754_v48 }
 0x1e7   : > { %v804_v28 = vadd.f32 %v803_v14, %v755_v60 }
 0x1e9   : > { %v1294_v44 = vmul.f32 0.17677669, %v804_v28 }
 0x1ec   : > { %1376 = vmatpush.bf16.xpose.msra.mxu2 %v1346_v47  ;;  %1213 = vmatmul.bf16.gmra.mxu0 %v3072_v13  ;;  %v1306_v13 = vpack.c.bf16 %v1293_v18, %v1292_v20  ;;  %v805_v19 = vpop.f32.mrf.mxu1 }
 0x1ed   : > { %1262 = vmatmul.bf16.gmra.mxu1 %v3077_v16  ;;  %v756_v16 = vpop.f32.mrf.mxu0 }
 0x1ee   : > { %v757_v5 = vadd.f32 %v3093_v17, %v756_v16 }
 0x1f0   : > { %v806_v40 = vadd.f32 %v805_v19, %v757_v5 }
 0x1f2   : > { %v1295_v43 = vmul.f32 0.17677669, %v806_v40 }
 0x1f3   : > { %2420 = vmatmul.msk.bf16.vlgmr.msra.gmra.mxu2 %vm1320_vm0, %v1304_v2  ;;  %v1302_v2 = vmul.f32 0.17677669, %v3640_v55 }
 0x1fc   : > { %1218 = vmatmul.bf16.gmra.mxu0 %v2986_v21  ;;  %v1307_v21 = vpack.c.bf16 %v1295_v43, %v1294_v44 }
 0x1fd   : > { %1267 = vmatmul.bf16.gmra.mxu1 %v2988_v22  ;;  %v762_v22 = vadd.f32 %v3093_v17, %v3098_v24  ;;  %v1298_v24 = vmul.f32 0.17677669, %v3105_v29 }
 0x1ff   : > { %v811_v56 = vadd.f32 %v3100_v25, %v762_v22  ;;  %v3267_v25 = vld [vmem:[%s459_s9] ss:$0 sm:$0xff] }
 0x201   : > { %v1297_v41 = vmul.f32 0.17677669, %v811_v56 }
 0x203   : > { %2421 = vmatmul.msk.bf16.gmra.mxu2 %vm1320_vm0, %v1305_v10  ;;  %v1308_v9 = vpack.c.bf16 %v1297_v41, %v1296_v8 }
 0x20c   : > { %1223 = vmatmul.bf16.gmra.mxu0 %v3004_v35  ;;  %v767_v35 = vadd.f32 %v3093_v17, %v3107_v30 }
 0x20d   : > { %1272 = vmatmul.bf16.gmra.mxu1 %v3006_v36 }
 0x20e   : > { %v816_v36 = vadd.f32 %v3109_v31, %v767_v35 }
 0x210   : > { %v1299_v15 = vmul.f32 0.17677669, %v816_v36 }
 0x213   : > { %2422 = vmatmul.msk.bf16.gmra.mxu2 %vm1320_vm0, %v1306_v13 }
 0x21c   : > { %1228 = vmatmul.bf16.gmra.mxu0 %v3027_v52  ;;  %v1309_v52 = vpack.c.bf16 %v1299_v15, %v1298_v24 }
 0x21d   : > { %1277 = vmatmul.bf16.gmra.mxu1 %v3029_v53  ;;  %v772_v53 = vadd.f32 %v3093_v17, %v3116_v38 }
 0x21f   : > { %v821_v23 = vadd.f32 %v3118_v39, %v772_v53  ;;  %v3638_v39 = vld [vmem:[#allocation18_spill] sm:$0xff] }
 0x220   : > { %v777_v45 = vadd.f32 %v3093_v17, %v3638_v39 }
 0x221   : > { %v1301_v31 = vmul.f32 0.17677669, %v821_v23 }
 0x222   : > { %v826_v46 = vadd.f32 %v3639_v59, %v777_v45 }
 0x223   : > { %2423 = vmatmul.msk.bf16.gmra.mxu2 %vm1320_vm0, %v1307_v21  ;;  %v1310_v57 = vpack.c.bf16 %v1301_v31, %v1300_v6 }
 0x224   : > { %v1303_v54 = vmul.f32 0.17677669, %v826_v46 }
 0x226   : > { %v1311_v11 = vpack.c.bf16 %v1303_v54, %v1302_v2 }
 0x22c   : > { %1233 = vmatmul.bf16.gmra.mxu0 %v3047_v0 }
 0x22d   : > { %1282 = vmatmul.bf16.gmra.mxu1 %v3049_v1 }
 0x233   : > { %2424 = vmatmul.msk.bf16.gmra.mxu2 %vm1320_vm0, %v1308_v9 }
 0x239   : > { %v1199_v30 = vpop.f32.mrf.mxu0 }
 0x23a   : > { %v1248_v0 = vpop.f32.mrf.mxu1  ;;  %v1200_v1 = vadd.f32 %v3267_v25, %v1199_v30 }
 0x23c   : > { %v3270_v29 = vadd.f32 %v1248_v0, %v1200_v1 }
 0x241   : > { %v3273_v63 = vpop.f32.mrf.mxu0 }
 0x242   : > { %v3275_v38 = vpop.f32.mrf.mxu1 }
 0x243   : > { %2425 = vmatmul.msk.bf16.gmra.mxu2 %vm1320_vm0, %v1309_v52 }
 0x249   : > { %v1204_v4 = vpop.f32.mrf.mxu0 }
 0x24a   : > { %v1253_v58 = vpop.f32.mrf.mxu1  ;;  %v1205_v47 = vadd.f32 %v3267_v25, %v1204_v4 }
 0x24c   : > { %v3282_v61 = vadd.f32 %v1253_v58, %v1205_v47 }
 0x251   : > { %v3285_v26 = vpop.f32.mrf.mxu0 }
 0x252   : > { %v3287_v51 = vpop.f32.mrf.mxu1 }
 0x253   : > { %2426 = vmatmul.msk.bf16.gmra.mxu2 %vm1320_vm0, %v1310_v57 }
 0x259   : > { %v1209_v49 = vpop.f32.mrf.mxu0 }
 0x25a   : > { %v1258_v17 = vpop.f32.mrf.mxu1  ;;  %v1210_v37 = vadd.f32 %v3267_v25, %v1209_v49 }
 0x25c   : > { %v3291_v42 = vadd.f32 %v1258_v17, %v1210_v37 }
 0x261   : > { %v3293_v50 = vpop.f32.mrf.mxu0 }
 0x262   : > { %v3295_v27 = vpop.f32.mrf.mxu1  ;;  %v1212_v49 = vadd.f32 %v3267_v25, %v3293_v50 }
 0x263   : > { %2427 = vmatmul.msk.bf16.gmra.mxu2 %vm1320_vm0, %v1311_v11 }
 0x269   : > { %v1214_v10 = vpop.f32.mrf.mxu0 }
 0x26a   : > { %v1263_v32 = vpop.f32.mrf.mxu1  ;;  %v1215_v33 = vadd.f32 %v3267_v25, %v1214_v10  ;;  %v1207_v10 = vadd.f32 %v3267_v25, %v3285_v26 }
 0x26c   : > { %v3301_v34 = vadd.f32 %v1263_v32, %v1215_v33  ;;  %v1261_v32 = vadd.f32 %v3295_v27, %v1212_v49 }
 0x271   : > { %v1216_v3 = vpop.f32.mrf.mxu0 }
 0x272   : > { %v1265_v12 = vpop.f32.mrf.mxu1  ;;  %v1217_v55 = vadd.f32 %v3267_v25, %v1216_v3  ;;  %v1202_v3 = vadd.f32 %v3267_v25, %v3273_v63 }
 0x274   : > { %v1266_v17 = vadd.f32 %v1265_v12, %v1217_v55  ;;  %v1251_v50 = vadd.f32 %v3275_v38, %v1202_v3 }
 0x276   : > { %v3297_v7 = vpop.f32.mrf.mxu2  ;;  %v1573_v33 = vpack.c.bf16 %v1266_v17, %v3301_v34  ;;  %v1570_v26 = vpack.c.bf16 %v1251_v50, %v3270_v29 }
 0x277   : > { %1418 = vmax.xlane.f32.xlu0 %v3297_v7 }
 0x279   : > { %v1219_v20 = vpop.f32.mrf.mxu0 }
 0x27a   : > { %v1268_v18 = vpop.f32.mrf.mxu1  ;;  %v1220_v13 = vadd.f32 %v3267_v25, %v1219_v20  ;;  %v1256_v20 = vadd.f32 %v3287_v51, %v1207_v10 }
 0x27c   : > { %v1269_v16 = vadd.f32 %v1268_v18, %v1220_v13  ;;  %v1572_v18 = vpack.c.bf16 %v1261_v32, %v3291_v42  ;;  %v1571_v12 = vpack.c.bf16 %v1256_v20, %v3282_v61 }
 0x27e   : > { %v3303_v48 = vpop.f32.mrf.mxu2 }
 0x27f   : > { %1420 = vmax.xlane.f32.xlu0 %v3303_v48 }
 0x281   : > { %v1221_v5 = vpop.f32.mrf.mxu0 }
 0x282   : > { %v1270_v19 = vpop.f32.mrf.mxu1  ;;  %v1222_v4 = vadd.f32 %v3267_v25, %v1221_v5 }
 0x284   : > { %v1271_v2 = vadd.f32 %v1270_v19, %v1222_v4 }
 0x286   : > { %v3306_v14 = vpop.f32.mrf.mxu2  ;;  %v1574_v37 = vpack.c.bf16 %v1271_v2, %v1269_v16 }
 0x287   : > { %1422 = vmax.xlane.f32.xlu1 %v3306_v14 }
 0x289   : > { %v1224_v40 = vpop.f32.mrf.mxu0 }
 0x28a   : > { %v1273_v44 = vpop.f32.mrf.mxu1  ;;  %v1225_v6 = vadd.f32 %v3267_v25, %v1224_v40 }
 0x28c   : > { %v1274_v58 = vadd.f32 %v1273_v44, %v1225_v6 }
 0x28e   : > { %v3310_v60 = vpop.f32.mrf.mxu2 }
 0x28f   : > { %1424 = vmax.xlane.f32.xlu1 %v3310_v60 }
 0x291   : > { %v1226_v21 = vpop.f32.mrf.mxu0 }
 0x292   : > { %v1275_v22 = vpop.f32.mrf.mxu1  ;;  %v1227_v57 = vadd.f32 %v3267_v25, %v1226_v21 }
 0x294   : > { %v1276_v47 = vadd.f32 %v1275_v22, %v1227_v57 }
 0x296   : > { %v3313_v28 = vpop.f32.mrf.mxu2  ;;  %v1575_v11 = vpack.c.bf16 %v1276_v47, %v1274_v58 }
 0x297   : > { %1426 = vmax.xlane.f32.xlu2 %v3313_v28 }
 0x299   : > { %v1229_v41 = vpop.f32.mrf.mxu0 }
 0x29a   : > { %v1278_v8 = vpop.f32.mrf.mxu1  ;;  %v1230_v23 = vadd.f32 %v3267_v25, %v1229_v41 }
 0x29c   : > { %v1279_v39 = vadd.f32 %v1278_v8, %v1230_v23 }
 0x29e   : > { %v3316_v43 = vpop.f32.mrf.mxu2 }
 0x29f   : > { %1428 = vmax.xlane.f32.xlu2 %v3316_v43 }
 0x2a1   : > { %v1231_v35 = vpop.f32.mrf.mxu0 }
 0x2a2   : > { %v1280_v36 = vpop.f32.mrf.mxu1  ;;  %v1232_v30 = vadd.f32 %v3267_v25, %v1231_v35 }
 0x2a4   : > { %v1281_v45 = vadd.f32 %v1280_v36, %v1232_v30 }
 0x2a6   : > { %v3319_v56 = vpop.f32.mrf.mxu2  ;;  %v1576_v54 = vpack.c.bf16 %v1281_v45, %v1279_v39 }
 0x2a7   : > { %1430 = vmax.xlane.f32.xlu0 %v3319_v56 }
 0x2a9   : > { %v1234_v24 = vpop.f32.mrf.mxu0 }
 0x2aa   : > { %v1283_v52 = vpop.f32.mrf.mxu1  ;;  %v1235_v53 = vadd.f32 %v3267_v25, %v1234_v24 }
 0x2ac   : > { %v1284_v31 = vadd.f32 %v1283_v52, %v1235_v53 }
 0x2ae   : > { %v3322_v9 = vpop.f32.mrf.mxu2 }
 0x2af   : > { %1432 = vmax.xlane.f32.xlu1 %v3322_v9 }
 0x2b1   : > { %v1236_v0 = vpop.f32.mrf.mxu0 }
 0x2b2   : > { %v1285_v1 = vpop.f32.mrf.mxu1  ;;  %v1237_v62 = vadd.f32 %v3267_v25, %v1236_v0 }
 0x2b4   : > { %v1286_v59 = vadd.f32 %v1285_v1, %v1237_v62 }
 0x2b6   : > { %v3325_v15 = vpop.f32.mrf.mxu2  ;;  %v1577_v46 = vpack.c.bf16 %v1286_v59, %v1284_v31 }
 0x2b7   : > { %1434 = vmax.xlane.f32.xlu1 %v3325_v15 }
 0x2b8   : > { %1578 = vmatpush.bf16.msra.mxu3 %v1577_v46 }
 0x2bc   : > { %1579 = vmatpush.bf16.msra.mxu3 %v1576_v54 }
 0x2be   : > { %v3350_v25 = vpop.f32.mrf.mxu2 }
 0x2c0   : > { %1580 = vmatpush.bf16.msra.mxu3 %v1575_v11 }
 0x2c4   : > { %1581 = vmatpush.bf16.msra.mxu3 %v1574_v37 }
 0x2c6   : > { %v3356_v29 = vpop.f32.mrf.mxu2 }
 0x2c8   : > { %1582 = vmatpush.bf16.msra.mxu3 %v1573_v33 }
 0x2cc   : > { %1583 = vmatpush.bf16.msra.mxu3 %v1572_v18 }
 0x2ce   : > { %v3366_v44 = vpop.f32.mrf.mxu2 }
 0x2d0   : > { %1584 = vmatpush.bf16.msra.mxu3 %v1571_v12 }
 0x2d4   : > { %1585 = vmatpush.bf16.msra.mxu3 %v1570_v26 }
 0x2ea   : > { %v1419_v27 = vpop.xlane.xlu0 %1418 }
 0x2eb   : > { %v1450_v34 = vsub.f32 %v3297_v7, %v1419_v27 }
 0x2ed   : > { %v1466_v13 = vmul.f32 1.442695, %v1450_v34 }
 0x2ef   : > { %2633 = vpow2.f32 %v1466_v13 }
 0x2f2   : > { %v1421_v63 = vpop.xlane.xlu0 %1420 }
 0x2f3   : > { %v1451_v51 = vsub.f32 %v3303_v48, %v1421_v63 }
 0x2f5   : > { %v3353_v42 = vpop.eup %2633  ;;  %v1468_v38 = vmul.f32 1.442695, %v1451_v51 }
 0x2f6   : > { %1498 = vadd.xlane.f32.xlu2 %v3353_v42 }
 0x2f7   : > { %2635 = vpow2.f32 %v1468_v38 }
 0x2fa   : > { %v1423_v61 = vpop.xlane.xlu1 %1422 }
 0x2fb   : > { %v1452_v16 = vsub.f32 %v3306_v14, %v1423_v61 }
 0x2fd   : > { %v3359_v5 = vpop.eup %2635  ;;  %v1470_v7 = vmul.f32 1.442695, %v1452_v16 }
 0x2fe   : > { %1500 = vadd.xlane.f32.xlu0 %v3359_v5  ;;  %1436 = vmax.xlane.f32.xlu2 %v3350_v25 }
 0x2ff   : > { %2637 = vpow2.f32 %v1470_v7 }
 0x302   : > { %v1425_v48 = vpop.xlane.xlu1 %1424 }
 0x303   : > { %v1453_v19 = vsub.f32 %v3310_v60, %v1425_v48  ;;  %v3375_v60 = vpop.f32.mrf.mxu2 }
 0x305   : > { %v3364_v40 = vpop.eup %2637  ;;  %v1472_v21 = vmul.f32 1.442695, %v1453_v19 }
 0x306   : > { %1502 = vadd.xlane.f32.xlu0 %v3364_v40  ;;  %1438 = vmax.xlane.f32.xlu2 %v3356_v29 }
 0x307   : > { %2639 = vpow2.f32 %v1472_v21 }
 0x30a   : > { %v1427_v14 = vpop.xlane.xlu2 %1426 }
 0x30b   : > { %v1454_v22 = vsub.f32 %v3313_v28, %v1427_v14  ;;  %v3382_v28 = vpop.f32.mrf.mxu2 }
 0x30d   : > { %v3371_v41 = vpop.eup %2639  ;;  %v1474_v8 = vmul.f32 1.442695, %v1454_v22 }
 0x30e   : > { %1504 = vadd.xlane.f32.xlu1 %v3371_v41  ;;  %1440 = vmax.xlane.f32.xlu0 %v3366_v44 }
 0x30f   : > { %2641 = vpow2.f32 %v1474_v8 }
 0x312   : > { %v1429_v35 = vpop.xlane.xlu2 %1428 }
 0x313   : > { %v1455_v36 = vsub.f32 %v3316_v43, %v1429_v35  ;;  %v3389_v1 = vpop.f32.mrf.mxu2 }
 0x315   : > { %v3378_v24 = vpop.eup %2641  ;;  %v1476_v52 = vmul.f32 1.442695, %v1455_v36 }
 0x316   : > { %1506 = vadd.xlane.f32.xlu1 %v3378_v24  ;;  %1442 = vmax.xlane.f32.xlu0 %v3375_v60 }
 0x317   : > { %2643 = vpow2.f32 %v1476_v52 }
 0x31a   : > { %v1431_v53 = vpop.xlane.xlu0 %1430 }
 0x31b   : > { %v1456_v23 = vsub.f32 %v3319_v56, %v1431_v53  ;;  %v3399_v45 = vpop.f32.mrf.mxu2 }
 0x31d   : > { %v3385_v30 = vpop.eup %2643  ;;  %v1478_v0 = vmul.f32 1.442695, %v1456_v23 }
 0x31e   : > { %1508 = vadd.xlane.f32.xlu2 %v3385_v30  ;;  %1444 = vmax.xlane.f32.xlu1 %v3382_v28 }
 0x31f   : > { %2645 = vpow2.f32 %v1478_v0 }
 0x322   : > { %v1433_v43 = vpop.xlane.xlu1 %1432 }
 0x323   : > { %v1457_v31 = vsub.f32 %v3322_v9, %v1433_v43 }
 0x325   : > { %v3392_v62 = vpop.eup %2645  ;;  %v1480_v6 = vmul.f32 1.442695, %v1457_v31 }
 0x326   : > { %1510 = vadd.xlane.f32.xlu2 %v3392_v62  ;;  %1446 = vmax.xlane.f32.xlu1 %v3389_v1 }
 0x327   : > { %2647 = vpow2.f32 %v1480_v6  ;;  %v2438_v6 = vld [vmem:[%s2961_s21 + $0x10] sm:$0xf] }
 0x32a   : > { %v1435_v56 = vpop.xlane.xlu1 %1434 }
 0x32b   : > { %v1458_v57 = vsub.f32 %v3325_v15, %v1435_v56  ;;  %v2538_v56 = vld [vmem:[%s2961_s21 + $0x14] sm:$0xf0] }
 0x32d   : > { %v3397_v39 = vpop.eup %2647  ;;  %v1482_v59 = vmul.f32 1.442695, %v1458_v57  ;;  %v2537_v57 = vld [vmem:[%s2961_s21 + $0x14] sm:$0xf] }
 0x32e   : > { %1512 = vadd.xlane.f32.xlu0 %v3397_v39  ;;  %1448 = vmax.xlane.f32.xlu2 %v3399_v45 }
 0x32f   : > { %2649 = vpow2.f32 %v1482_v59  ;;  %v2440_v59 = vld [vmem:[%s2961_s21 + $0x18] sm:$0xf0] }
 0x335   : > { %v3403_v9 = vpop.eup %2649 }
 0x336   : > { %1514 = vadd.xlane.f32.xlu0 %v3403_v9 }
 0x369   : > { %v1499_v46 = vpop.xlane.xlu2 %1498 }
 0x36a   : > { %2651 = vrcp.f32 %v1499_v46  ;;  %v2443_v46 = vor.u32 %v2537_v57, %v2440_v59  ;;  %v1631_v59 = vld [vmem:[#allocation2 + $0x50] sm:$0xff] }
 0x36c   : > { %1770 = vmatpush.bf16.msra.mxu1 %v2443_v46  ;;  %v1632_v46 = vld [vmem:[#allocation2 + $0x68] sm:$0xff] }
 0x370   : > { %v2652_v54 = vpop.eup %2651 }
 0x371   : > { %v1501_v4 = vpop.xlane.xlu0 %1500  ;;  %v1437_v58 = vpop.xlane.xlu2 %1436  ;;  %v1546_v2 = vmul.f32 %v2652_v54, %v3353_v42 }
 0x372   : > { %2653 = vrcp.f32 %v1501_v4  ;;  %v1459_v15 = vsub.f32 %v3350_v25, %v1437_v58  ;;  %v2430_v4 = vld [vmem:[%s2961_s21] sm:$0xf]  ;;  %v2535_v58 = vld [vmem:[%s2961_s21 + $0x4] sm:$0xf] }
 0x374   : > { %v1484_v47 = vmul.f32 1.442695, %v1459_v15 }
 0x376   : > { %2655 = vpow2.f32 %v1484_v47 }
 0x378   : > { %v2654_v55 = vpop.eup %2653 }
 0x379   : > { %v1547_v11 = vmul.f32 %v2654_v55, %v3359_v5  ;;  %v1503_v49 = vpop.xlane.xlu0 %1502  ;;  %v1439_v17 = vpop.xlane.xlu2 %1438 }
 0x37a   : > { %v1460_v37 = vsub.f32 %v3356_v29, %v1439_v17 }
 0x37b   : > { %v1562_v10 = vpack.c.bf16 %v1547_v11, %v1546_v2 }
 0x37c   : > { %v3410_v32 = vpop.eup %2655  ;;  %v1486_v33 = vmul.f32 1.442695, %v1460_v37 }
 0x37d   : > { %1586 = vmatmul.bf16.vlgmr.msra.gmra.mxu3 %v1562_v10  ;;  %1516 = vadd.xlane.f32.xlu1 %v3410_v32 }
 0x37e   : > { %2657 = vpow2.f32 %v1486_v33 }
 0x37f   : > { %2659 = vrcp.f32 %v1503_v49 }
 0x381   : > { %v1505_v3 = vpop.xlane.xlu1 %1504  ;;  %v1441_v20 = vpop.xlane.xlu0 %1440 }
 0x382   : > { %2661 = vrcp.f32 %v1505_v3  ;;  %v1461_v18 = vsub.f32 %v3366_v44, %v1441_v20 }
 0x384   : > { %v3414_v50 = vpop.eup %2657  ;;  %v1488_v12 = vmul.f32 1.442695, %v1461_v18 }
 0x385   : > { %1518 = vadd.xlane.f32.xlu2 %v3414_v50  ;;  %v2660_v26 = vpop.eup %2659 }
 0x386   : > { %2663 = vpow2.f32 %v1488_v12  ;;  %v1548_v25 = vmul.f32 %v2660_v26, %v3364_v40 }
 0x388   : > { %v2662_v27 = vpop.eup %2661 }
 0x389   : > { %v1507_v34 = vpop.xlane.xlu1 %1506  ;;  %v1443_v13 = vpop.xlane.xlu0 %1442  ;;  %v1549_v63 = vmul.f32 %v2662_v27, %v3371_v41 }
 0x38a   : > { %v1462_v51 = vsub.f32 %v3375_v60, %v1443_v13 }
 0x38b   : > { %v1563_v42 = vpack.c.bf16 %v1549_v63, %v1548_v25 }
 0x38c   : > { %v3420_v38 = vpop.eup %2663  ;;  %v1490_v61 = vmul.f32 1.442695, %v1462_v51 }
 0x38d   : > { %1591 = vmatmul.bf16.gmra.mxu3 %v1563_v42  ;;  %1520 = vadd.xlane.f32.xlu0 %v3420_v38 }
 0x38e   : > { %2665 = vpow2.f32 %v1490_v61 }
 0x38f   : > { %2667 = vrcp.f32 %v1507_v34 }
 0x391   : > { %v1509_v29 = vpop.xlane.xlu2 %1508  ;;  %v1445_v16 = vpop.xlane.xlu1 %1444 }
 0x392   : > { %2669 = vrcp.f32 %v1509_v29  ;;  %v1463_v5 = vsub.f32 %v3382_v28, %v1445_v16 }
 0x394   : > { %v3424_v7 = vpop.eup %2665  ;;  %v1492_v48 = vmul.f32 1.442695, %v1463_v5 }
 0x395   : > { %1522 = vadd.xlane.f32.xlu1 %v3424_v7  ;;  %v2668_v19 = vpop.eup %2667 }
 0x396   : > { %2671 = vpow2.f32 %v1492_v48  ;;  %v1550_v14 = vmul.f32 %v2668_v19, %v3378_v24 }
 0x398   : > { %v2670_v40 = vpop.eup %2669 }
 0x399   : > { %v1511_v44 = vpop.xlane.xlu2 %1510  ;;  %v1447_v21 = vpop.xlane.xlu1 %1446  ;;  %v1551_v22 = vmul.f32 %v2670_v40, %v3385_v30 }
 0x39a   : > { %v1464_v41 = vsub.f32 %v3389_v1, %v1447_v21 }
 0x39b   : > { %v1564_v8 = vpack.c.bf16 %v1551_v22, %v1550_v14 }
 0x39c   : > { %v3430_v60 = vpop.eup %2671  ;;  %v1494_v35 = vmul.f32 1.442695, %v1464_v41 }
 0x39d   : > { %1596 = vmatmul.bf16.gmra.mxu3 %v1564_v8  ;;  %1524 = vadd.xlane.f32.xlu2 %v3430_v60 }
 0x39e   : > { %2673 = vpow2.f32 %v1494_v35 }
 0x39f   : > { %2675 = vrcp.f32 %v1511_v44 }
 0x3a1   : > { %v1513_v36 = vpop.xlane.xlu0 %1512  ;;  %v1449_v52 = vpop.xlane.xlu2 %1448 }
 0x3a2   : > { %2677 = vrcp.f32 %v1513_v36  ;;  %v1465_v24 = vsub.f32 %v3399_v45, %v1449_v52  ;;  %v2439_v45 = vor.u32 %v2538_v56, %v2438_v6  ;;  %v1627_v36 = vld [vmem:[#allocation2 + $0xb0] sm:$0xff]  ;;  %v1628_v52 = vld [vmem:[#allocation2] sm:$0xff] }
 0x3a4   : > { %v3434_v28 = vpop.eup %2673  ;;  %v1496_v53 = vmul.f32 1.442695, %v1465_v24  ;;  %1721 = vmatpush.bf16.msra.mxu0 %v2439_v45 }
 0x3a5   : > { %1526 = vadd.xlane.f32.xlu0 %v3434_v28  ;;  %v2676_v23 = vpop.eup %2675 }
 0x3a6   : > { %2679 = vpow2.f32 %v1496_v53  ;;  %v1552_v0 = vmul.f32 %v2676_v23, %v3392_v62  ;;  %v2536_v62 = vld [vmem:[%s2961_s21 + $0x4] sm:$0xf0] }
 0x3a7   : > { %v2431_v15 = vor.u32 %v2536_v62, %v2430_v4 }
 0x3a8   : > { %v2678_v30 = vpop.eup %2677 }
 0x3a9   : > { %v1553_v43 = vmul.f32 %v2678_v30, %v3397_v39  ;;  %v2432_v39 = vld [vmem:[%s2961_s21 + $0x8] sm:$0xf0]  ;;  %1722 = vmatpush.bf16.msra.mxu0 %v2431_v15  ;;  %v1515_v54 = vpop.xlane.xlu0 %1514 }
 0x3aa   : > { %v2435_v47 = vor.u32 %v2535_v58, %v2432_v39  ;;  %2681 = vrcp.f32 %v1515_v54  ;;  %v1633_v54 = vld [vmem:[#allocation2 + $0x30] sm:$0xff] }
 0x3ab   : > { %v1565_v1 = vpack.c.bf16 %v1553_v43, %v1552_v0  ;;  %v1629_v43 = vld [vmem:[#allocation2 + $0xd8] sm:$0xff] }
 0x3ac   : > { %v3439_v31 = vpop.eup %2679  ;;  %1771 = vmatpush.bf16.msra.mxu1 %v2435_v47 }
 0x3ad   : > { %1601 = vmatmul.bf16.gmra.mxu3 %v1565_v1  ;;  %1528 = vadd.xlane.f32.xlu1 %v3439_v31  ;;  %v1630_v1 = vld [vmem:[#allocation2 + $0x18] sm:$0xff] }
 0x3b0   : > { %v2682_v2 = vpop.eup %2681 }
 0x3b1   : > { %v1554_v49 = vmul.f32 %v2682_v2, %v3403_v9 }
 0x3f0   : > { %v1517_v55 = vpop.xlane.xlu1 %1516 }
 0x3f1   : > { %2683 = vrcp.f32 %v1517_v55  ;;  %v1634_v55 = vld [vmem:[#allocation2 + $0x48] sm:$0xff] }
 0x3f7   : > { %v2684_v11 = vpop.eup %2683 }
 0x3f8   : > { %v1555_v17 = vmul.f32 %v2684_v11, %v3410_v32  ;;  %v1519_v10 = vpop.xlane.xlu2 %1518 }
 0x3f9   : > { %2685 = vrcp.f32 %v1519_v10  ;;  %v1635_v10 = vld [vmem:[#allocation2 + $0x80] sm:$0xff] }
 0x3fa   : > { %v1566_v37 = vpack.c.bf16 %v1555_v17, %v1554_v49 }
 0x3fc   : > { %1606 = vmatmul.bf16.gmra.mxu3 %v1566_v37 }
 0x3ff   : > { %v2686_v20 = vpop.eup %2685 }
 0x400   : > { %v1587_v33 = vpop.f32.mrf.mxu3  ;;  %v1521_v3 = vpop.xlane.xlu0 %1520  ;;  %v1556_v26 = vmul.f32 %v2686_v20, %v3414_v50 }
 0x401   : > { %2687 = vrcp.f32 %v1521_v3 }
 0x407   : > { %v2688_v18 = vpop.eup %2687 }
 0x408   : > { %v1589_v12 = vpop.f32.mrf.mxu3  ;;  %v1557_v27 = vmul.f32 %v2688_v18, %v3420_v38  ;;  %v1523_v9 = vpop.xlane.xlu1 %1522 }
 0x409   : > { %v1659_v34 = vpack.c.bf16 %v1589_v12, %v1587_v33  ;;  %2689 = vrcp.f32 %v1523_v9  ;;  %v1636_v33 = vld [vmem:[#allocation2 + $0x88] sm:$0xff] }
 0x40a   : > { %v1567_v13 = vpack.c.bf16 %v1557_v27, %v1556_v26 }
 0x40b   : > { %2444 = vmatmul.msk.bf16.vlgmr.msra.gmra.mxu0 %vm1320_vm0, %v1659_v34  ;;  %2452 = vmatmul.msk.bf16.vlgmr.msra.gmra.mxu1 %vm1320_vm0, %v1659_v34  ;;  %v1637_v34 = vld [vmem:[#allocation2 + $0xe8] sm:$0xff] }
 0x40c   : > { %1611 = vmatmul.bf16.gmra.mxu3 %v1567_v13  ;;  %v1638_v13 = vld [vmem:[#allocation2 + $0xb8] sm:$0xff] }
 0x40f   : > { %v2690_v63 = vpop.eup %2689 }
 0x410   : > { %v1592_v32 = vpop.f32.mrf.mxu3  ;;  %v1525_v25 = vpop.xlane.xlu2 %1524  ;;  %v1558_v61 = vmul.f32 %v2690_v63, %v3424_v7 }
 0x411   : > { %2691 = vrcp.f32 %v1525_v25 }
 0x417   : > { %v2692_v51 = vpop.eup %2691 }
 0x418   : > { %v1594_v42 = vpop.f32.mrf.mxu3  ;;  %v1559_v50 = vmul.f32 %v2692_v51, %v3430_v60  ;;  %v1527_v16 = vpop.xlane.xlu0 %1526 }
 0x419   : > { %v1660_v38 = vpack.c.bf16 %v1594_v42, %v1592_v32  ;;  %2693 = vrcp.f32 %v1527_v16  ;;  %v1639_v42 = vld [vmem:[#allocation2 + $0x60] sm:$0xff] }
 0x41a   : > { %v1568_v29 = vpack.c.bf16 %v1559_v50, %v1558_v61  ;;  %v1640_v61 = vld [vmem:[#allocation2 + $0xf0] sm:$0xff] }
 0x41b   : > { %2445 = vmatmul.msk.bf16.gmra.mxu0 %vm1320_vm0, %v1660_v38  ;;  %2453 = vmatmul.msk.bf16.gmra.mxu1 %vm1320_vm0, %v1660_v38 }
 0x41c   : > { %1616 = vmatmul.bf16.gmra.mxu3 %v1568_v29 }
 0x41f   : > { %v2694_v19 = vpop.eup %2693 }
 0x420   : > { %v1597_v5 = vpop.f32.mrf.mxu3  ;;  %v1529_v48 = vpop.xlane.xlu1 %1528  ;;  %v1560_v21 = vmul.f32 %v2694_v19, %v3434_v28  ;;  %v1641_v19 = vld [vmem:[#allocation2 + $0x8] sm:$0xff] }
 0x421   : > { %2695 = vrcp.f32 %v1529_v48 }
 0x427   : > { %v2696_v40 = vpop.eup %2695 }
 0x428   : > { %v1599_v44 = vpop.f32.mrf.mxu3  ;;  %v1561_v7 = vmul.f32 %v2696_v40, %v3439_v31  ;;  %v1642_v40 = vld [vmem:[#allocation2 + $0x78] sm:$0xff] }
 0x429   : > { %v1661_v14 = vpack.c.bf16 %v1599_v44, %v1597_v5 }
 0x42a   : > { %v1569_v22 = vpack.c.bf16 %v1561_v7, %v1560_v21 }
 0x42b   : > { %2446 = vmatmul.msk.bf16.gmra.mxu0 %vm1320_vm0, %v1661_v14  ;;  %2454 = vmatmul.msk.bf16.gmra.mxu1 %vm1320_vm0, %v1661_v14 }
 0x42c   : > { %1621 = vmatmul.bf16.gmra.mxu3 %v1569_v22  ;;  %v1643_v22 = vld [vmem:[#allocation2 + $0x38] sm:$0xff] }
 0x430   : > { %v1602_v41 = vpop.f32.mrf.mxu3 }
 0x438   : > { %v1604_v8 = vpop.f32.mrf.mxu3 }
 0x439   : > { %v1662_v60 = vpack.c.bf16 %v1604_v8, %v1602_v41  ;;  %v1644_v41 = vld [vmem:[#allocation2 + $0x58] sm:$0xff] }
 0x43b   : > { %2447 = vmatmul.msk.bf16.gmra.mxu0 %vm1320_vm0, %v1662_v60  ;;  %2455 = vmatmul.msk.bf16.gmra.mxu1 %vm1320_vm0, %v1662_v60 }
 0x47f   : > { %v1607_v35 = vpop.f32.mrf.mxu3 }
 0x487   : > { %v1609_v24 = vpop.f32.mrf.mxu3 }
 0x488   : > { %v1663_v28 = vpack.c.bf16 %v1609_v24, %v1607_v35  ;;  %v1724_v53 = vpop.f32.mrf.mxu0  ;;  %v1773_v23 = vpop.f32.mrf.mxu1  ;;  %v1646_v24 = vld [vmem:[#allocation2 + $0xc8] sm:$0xff] }
 0x489   : > { %v1813_v30 = vadd.f32 %v1724_v53, %v1627_v36  ;;  %v1814_v0 = vadd.f32 %v1773_v23, %v1628_v52  ;;  %v1645_v52 = vld [vmem:[#allocation2 + $0x40] sm:$0xff] }
 0x48a   : > { %2448 = vmatmul.msk.bf16.gmra.mxu0 %vm1320_vm0, %v1663_v28  ;;  %2456 = vmatmul.msk.bf16.gmra.mxu1 %vm1320_vm0, %v1663_v28 }
 0x48b   : > { %1845 = vst [vmem:[#allocation2 + $0xb0] sm:$0xff] %v1813_v30 }
 0x48c   : > { %1846 = vst [vmem:[#allocation2] sm:$0xff] %v1814_v0  ;;  %v1647_v0 = vld [vmem:[#allocation2 + $0xe0] sm:$0xff] }
 0x48f   : > { %v1612_v31 = vpop.f32.mrf.mxu3 }
 0x490   : > { %v1726_v6 = vpop.f32.mrf.mxu0  ;;  %v1775_v56 = vpop.f32.mrf.mxu1 }
 0x491   : > { %v1815_v57 = vadd.f32 %v1726_v6, %v1629_v43  ;;  %v1816_v45 = vadd.f32 %v1775_v56, %v1630_v1  ;;  %v1648_v43 = vld [vmem:[#allocation2 + $0x90] sm:$0xff] }
 0x493   : > { %1847 = vst [vmem:[#allocation2 + $0xd8] sm:$0xff] %v1815_v57  ;;  %v1649_v57 = vld [vmem:[#allocation2 + $0x70] sm:$0xff] }
 0x494   : > { %1848 = vst [vmem:[#allocation2 + $0x18] sm:$0xff] %v1816_v45  ;;  %v1650_v45 = vld [vmem:[#allocation2 + $0xc0] sm:$0xff] }
 0x497   : > { %v1614_v4 = vpop.f32.mrf.mxu3 }
 0x498   : > { %v1664_v62 = vpack.c.bf16 %v1614_v4, %v1612_v31  ;;  %v1729_v58 = vpop.f32.mrf.mxu0  ;;  %v1778_v15 = vpop.f32.mrf.mxu1 }
 0x499   : > { %v1817_v39 = vadd.f32 %v1729_v58, %v1631_v59  ;;  %v1818_v47 = vadd.f32 %v1778_v15, %v1632_v46  ;;  %v1651_v58 = vld [vmem:[#allocation2 + $0xa8] sm:$0xff]  ;;  %v1652_v15 = vld [vmem:[#allocation2 + $0xd0] sm:$0xff] }
 0x49a   : > { %2449 = vmatmul.msk.bf16.gmra.mxu0 %vm1320_vm0, %v1664_v62  ;;  %2457 = vmatmul.msk.bf16.gmra.mxu1 %vm1320_vm0, %v1664_v62 }
 0x49b   : > { %1849 = vst [vmem:[#allocation2 + $0x50] sm:$0xff] %v1817_v39 }
 0x49c   : > { %1850 = vst [vmem:[#allocation2 + $0x68] sm:$0xff] %v1818_v47 }
 0x49f   : > { %v1617_v2 = vpop.f32.mrf.mxu3 }
 0x4a0   : > { %v1731_v11 = vpop.f32.mrf.mxu0  ;;  %v1780_v49 = vpop.f32.mrf.mxu1 }
 0x4a1   : > { %v1819_v17 = vadd.f32 %v1731_v11, %v1633_v54  ;;  %v1820_v37 = vadd.f32 %v1780_v49, %v1634_v55  ;;  %v1654_v11 = vld [vmem:[#allocation2 + $0x28] sm:$0xff] }
 0x4a3   : > { %1851 = vst [vmem:[#allocation2 + $0x30] sm:$0xff] %v1819_v17 }
 0x4a4   : > { %1852 = vst [vmem:[#allocation2 + $0x48] sm:$0xff] %v1820_v37 }
 0x4a7   : > { %v1619_v3 = vpop.f32.mrf.mxu3 }
 0x4a8   : > { %v1665_v20 = vpack.c.bf16 %v1619_v3, %v1617_v2  ;;  %v1734_v18 = vpop.f32.mrf.mxu0  ;;  %v1783_v12 = vpop.f32.mrf.mxu1  ;;  %v1653_v2 = vld [vmem:[#allocation2 + $0x10] sm:$0xff]  ;;  %v1656_v3 = vld [vmem:[#allocation2 + $0xf8] sm:$0xff] }
 0x4a9   : > { %v1821_v26 = vadd.f32 %v1734_v18, %v1635_v10  ;;  %v1822_v27 = vadd.f32 %v1783_v12, %v1636_v33  ;;  %v1655_v33 = vld [vmem:[#allocation2 + $0xa0] sm:$0xff] }
 0x4aa   : > { %2450 = vmatmul.msk.bf16.gmra.mxu0 %vm1320_vm0, %v1665_v20  ;;  %2458 = vmatmul.msk.bf16.gmra.mxu1 %vm1320_vm0, %v1665_v20 }
 0x4ab   : > { %1853 = vst [vmem:[#allocation2 + $0x80] sm:$0xff] %v1821_v26 }
 0x4ac   : > { %1854 = vst [vmem:[#allocation2 + $0x88] sm:$0xff] %v1822_v27  ;;  %v1657_v27 = vld [vmem:[#allocation2 + $0x20] sm:$0xff] }
 0x4af   : > { %v1622_v9 = vpop.f32.mrf.mxu3 }
 0x4b0   : > { %v1736_v32 = vpop.f32.mrf.mxu0  ;;  %v1785_v25 = vpop.f32.mrf.mxu1 }
 0x4b1   : > { %v1823_v63 = vadd.f32 %v1736_v32, %v1637_v34  ;;  %v1824_v51 = vadd.f32 %v1785_v25, %v1638_v13  ;;  %v1658_v34 = vld [vmem:[#allocation2 + $0x98] sm:$0xff] }
 0x4b3   : > { %1855 = vst [vmem:[#allocation2 + $0xe8] sm:$0xff] %v1823_v63 }
 0x4b4   : > { %1856 = vst [vmem:[#allocation2 + $0xb8] sm:$0xff] %v1824_v51 }
 0x4b7   : > { %v1624_v50 = vpop.f32.mrf.mxu3 }
 0x4b8   : > { %v1666_v38 = vpack.c.bf16 %v1624_v50, %v1622_v9  ;;  %v1739_v29 = vpop.f32.mrf.mxu0  ;;  %v1788_v16 = vpop.f32.mrf.mxu1 }
 0x4b9   : > { %v1825_v5 = vadd.f32 %v1739_v29, %v1639_v42  ;;  %v1826_v48 = vadd.f32 %v1788_v16, %v1640_v61 }
 0x4ba   : > { %2451 = vmatmul.msk.bf16.gmra.mxu0 %vm1320_vm0, %v1666_v38  ;;  %2459 = vmatmul.msk.bf16.gmra.mxu1 %vm1320_vm0, %v1666_v38 }
 0x4bb   : > { %1857 = vst [vmem:[#allocation2 + $0x60] sm:$0xff] %v1825_v5 }
 0x4bc   : > { %1858 = vst [vmem:[#allocation2 + $0xf0] sm:$0xff] %v1826_v48 }
 0x4c0   : > { %v1741_v44 = vpop.f32.mrf.mxu0  ;;  %v1790_v21 = vpop.f32.mrf.mxu1 }
 0x4c1   : > { %v1827_v7 = vadd.f32 %v1741_v44, %v1641_v19  ;;  %v1828_v14 = vadd.f32 %v1790_v21, %v1642_v40 }
 0x4c3   : > { %1859 = vst [vmem:[#allocation2 + $0x8] sm:$0xff] %v1827_v7 }
 0x4c4   : > { %1860 = vst [vmem:[#allocation2 + $0x78] sm:$0xff] %v1828_v14 }
 0x507   : > { %v1744_v8 = vpop.f32.mrf.mxu0  ;;  %v1793_v60 = vpop.f32.mrf.mxu1 }
 0x508   : > { %v1829_v35 = vadd.f32 %v1744_v8, %v1643_v22  ;;  %v1830_v36 = vadd.f32 %v1793_v60, %v1644_v41 }
 0x50a   : > { %1861 = vst [vmem:[#allocation2 + $0x38] sm:$0xff] %v1829_v35 }
 0x50b   : > { %1862 = vst [vmem:[#allocation2 + $0x58] sm:$0xff] %v1830_v36 }
 0x50f   : > { %v1746_v28 = vpop.f32.mrf.mxu0  ;;  %v1795_v53 = vpop.f32.mrf.mxu1 }
 0x510   : > { %v1831_v23 = vadd.f32 %v1746_v28, %v1645_v52  ;;  %v1832_v30 = vadd.f32 %v1795_v53, %v1646_v24 }
 0x512   : > { %1863 = vst [vmem:[#allocation2 + $0x40] sm:$0xff] %v1831_v23 }
 0x513   : > { %1864 = vst [vmem:[#allocation2 + $0xc8] sm:$0xff] %v1832_v30 }
 0x517   : > { %v1749_v1 = vpop.f32.mrf.mxu0  ;;  %v1798_v31 = vpop.f32.mrf.mxu1 }
 0x518   : > { %v1833_v6 = vadd.f32 %v1749_v1, %v1647_v0  ;;  %v1834_v56 = vadd.f32 %v1798_v31, %v1648_v43 }
 0x51a   : > { %1865 = vst [vmem:[#allocation2 + $0xe0] sm:$0xff] %v1833_v6 }
 0x51b   : > { %1866 = vst [vmem:[#allocation2 + $0x90] sm:$0xff] %v1834_v56 }
 0x51f   : > { %v1751_v59 = vpop.f32.mrf.mxu0  ;;  %v1800_v46 = vpop.f32.mrf.mxu1 }
 0x520   : > { %v1835_v4 = vadd.f32 %v1751_v59, %v1649_v57  ;;  %v1836_v62 = vadd.f32 %v1800_v46, %v1650_v45 }
 0x522   : > { %1867 = vst [vmem:[#allocation2 + $0x70] sm:$0xff] %v1835_v4 }
 0x523   : > { %1868 = vst [vmem:[#allocation2 + $0xc0] sm:$0xff] %v1836_v62 }
 0x527   : > { %v1754_v39 = vpop.f32.mrf.mxu0  ;;  %v1803_v47 = vpop.f32.mrf.mxu1 }
 0x528   : > { %v1837_v54 = vadd.f32 %v1754_v39, %v1651_v58  ;;  %v1838_v55 = vadd.f32 %v1803_v47, %v1652_v15 }
 0x52a   : > { %1869 = vst [vmem:[#allocation2 + $0xa8] sm:$0xff] %v1837_v54 }
 0x52b   : > { %1870 = vst [vmem:[#allocation2 + $0xd0] sm:$0xff] %v1838_v55 }
 0x52f   : > { %v1756_v49 = vpop.f32.mrf.mxu0  ;;  %v1805_v17 = vpop.f32.mrf.mxu1 }
 0x530   : > { %v1839_v37 = vadd.f32 %v1756_v49, %v1653_v2  ;;  %v1840_v10 = vadd.f32 %v1805_v17, %v1654_v11 }
 0x532   : > { %1871 = vst [vmem:[#allocation2 + $0x10] sm:$0xff] %v1839_v37 }
 0x533   : > { %1872 = vst [vmem:[#allocation2 + $0x28] sm:$0xff] %v1840_v10 }
 0x537   : > { %v1759_v20 = vpop.f32.mrf.mxu0  ;;  %v1808_v18 = vpop.f32.mrf.mxu1 }
 0x538   : > { %v1841_v12 = vadd.f32 %v1759_v20, %v1655_v33  ;;  %v1842_v26 = vadd.f32 %v1808_v18, %v1656_v3 }
 0x53a   : > { %1873 = vst [vmem:[#allocation2 + $0xa0] sm:$0xff] %v1841_v12 }
 0x53b   : > { %1874 = vst [vmem:[#allocation2 + $0xf8] sm:$0xff] %v1842_v26 }
 0x53f   : > { %v1761_v13 = vpop.f32.mrf.mxu0  ;;  %v1810_v9 = vpop.f32.mrf.mxu1  ;;  %1880 = sbr.rel (%p2460_p1) target bundleno = 1385 (0x569), region = 64 }
 0x540   : > { %v1843_v32 = vadd.f32 %v1761_v13, %v1657_v27  ;;  %v1844_v25 = vadd.f32 %v1810_v9, %v1658_v34 }
 0x542   : > { %1875 = vst [vmem:[#allocation2 + $0x20] sm:$0xff] %v1843_v32 }
 0x543   : > { %1876 = vst [vmem:[#allocation2 + $0x98] sm:$0xff] %v1844_v25 }
 0x544   : > { %v1881_v63 = vld [vmem:[#allocation2 + $0xb0] sm:$0xff]  ;;  %v1913_v51 = vld [vmem:[%s3599_s8] sm:$0x3]  ;;  %v1883_v38 = vld [vmem:[#allocation2 + $0xd8] sm:$0xff] }
 0x545   : > { %v1882_v42 = vld [vmem:[#allocation2] sm:$0xff]  ;;  %v3478_v61 = vperm.slane %v1913_v51, 0  ;;  %v3480_v50 = vperm.slane %v1913_v51, 1  ;;  %v1884_v29 = vld [vmem:[#allocation2 + $0x18] sm:$0xff]  ;;  %v1885_v16 = vld [vmem:[#allocation2 + $0x50] sm:$0xff] }
 0x546   : > { %v1886_v40 = vld [vmem:[#allocation2 + $0x68] sm:$0xff]  ;;  %v1887_v21 = vld [vmem:[#allocation2 + $0x30] sm:$0xff]  ;;  %v1889_v41 = vld [vmem:[#allocation2 + $0x80] sm:$0xff] }
 0x547   : > { %v1919_v5 = vadd.f32 %v3478_v61, %v1881_v63  ;;  %v1920_v48 = vadd.f32 %v3480_v50, %v1882_v42  ;;  %v1921_v19 = vadd.f32 %v3478_v61, %v1883_v38  ;;  %v1922_v44 = vadd.f32 %v3480_v50, %v1884_v29  ;;  %v1888_v14 = vld [vmem:[#allocation2 + $0x48] sm:$0xff]  ;;  %v1892_v24 = vld [vmem:[#allocation2 + $0xb8] sm:$0xff]  ;;  %v1893_v53 = vld [vmem:[#allocation2 + $0x60] sm:$0xff] }
 0x548   : > { %v1923_v7 = vadd.f32 %v3478_v61, %v1885_v16  ;;  %v1924_v22 = vadd.f32 %v3480_v50, %v1886_v40  ;;  %v1925_v8 = vadd.f32 %v3478_v61, %v1887_v21  ;;  %v1890_v60 = vld [vmem:[#allocation2 + $0x88] sm:$0xff]  ;;  %v1926_v35 = vadd.f32 %v3480_v50, %v1888_v14  ;;  %v1894_v30 = vld [vmem:[#allocation2 + $0xf0] sm:$0xff]  ;;  %v1896_v31 = vld [vmem:[#allocation2 + $0x78] sm:$0xff] }
 0x549   : > { %1951 = vst [vmem:[%s2963_s30] sm:$0xff] %v1919_v5  ;;  %v1891_v36 = vld [vmem:[#allocation2 + $0xe8] sm:$0xff]  ;;  %v1927_v52 = vadd.f32 %v3478_v61, %v1889_v41  ;;  %v1928_v28 = vadd.f32 %v3480_v50, %v1890_v60  ;;  %v1930_v0 = vadd.f32 %v3480_v50, %v1892_v24  ;;  %v1931_v1 = vadd.f32 %v3478_v61, %v1893_v53  ;;  %v1897_v56 = vld [vmem:[#allocation2 + $0x38] sm:$0xff]  ;;  %v1899_v46 = vld [vmem:[#allocation2 + $0x40] sm:$0xff] }
 0x54a   : > { %1952 = vst [vmem:[%s2963_s30 + $0x8] sm:$0xff] %v1920_v48  ;;  %v1929_v23 = vadd.f32 %v3478_v61, %v1891_v36  ;;  %v1895_v43 = vld [vmem:[#allocation2 + $0x8] sm:$0xff]  ;;  %v1932_v6 = vadd.f32 %v3480_v50, %v1894_v30  ;;  %v1898_v45 = vld [vmem:[#allocation2 + $0x58] sm:$0xff]  ;;  %v1934_v59 = vadd.f32 %v3480_v50, %v1896_v31  ;;  %v1935_v4 = vadd.f32 %v3478_v61, %v1897_v56  ;;  %v1901_v15 = vld [vmem:[#allocation2 + $0xe0] sm:$0xff] }
 0x54b   : > { %1953 = vst [vmem:[%s2963_s30 + $0x10] sm:$0xff] %v1921_v19  ;;  %v1933_v57 = vadd.f32 %v3478_v61, %v1895_v43  ;;  %v1900_v62 = vld [vmem:[#allocation2 + $0xc8] sm:$0xff]  ;;  %v1936_v58 = vadd.f32 %v3480_v50, %v1898_v45  ;;  %v1937_v39 = vadd.f32 %v3478_v61, %v1899_v46  ;;  %v1902_v47 = vld [vmem:[#allocation2 + $0x90] sm:$0xff]  ;;  %v1939_v2 = vadd.f32 %v3478_v61, %v1901_v15  ;;  %v1904_v11 = vld [vmem:[#allocation2 + $0xc0] sm:$0xff] }
 0x54c   : > { %1954 = vst [vmem:[%s2963_s30 + $0x18] sm:$0xff] %v1922_v44  ;;  %v1938_v54 = vadd.f32 %v3480_v50, %v1900_v62  ;;  %v1903_v55 = vld [vmem:[#allocation2 + $0x70] sm:$0xff]  ;;  %v1940_v49 = vadd.f32 %v3480_v50, %v1902_v47  ;;  %v1905_v17 = vld [vmem:[#allocation2 + $0xa8] sm:$0xff]  ;;  %v1942_v33 = vadd.f32 %v3480_v50, %v1904_v11  ;;  %v1909_v26 = vld [vmem:[#allocation2 + $0xa0] sm:$0xff] }
 0x54d   : > { %1955 = vst [vmem:[%s2963_s30 + $0x20] sm:$0xff] %v1923_v7  ;;  %v1941_v37 = vadd.f32 %v3478_v61, %v1903_v55  ;;  %v1906_v10 = vld [vmem:[#allocation2 + $0xd0] sm:$0xff]  ;;  %v1943_v20 = vadd.f32 %v3478_v61, %v1905_v17  ;;  %v1908_v18 = vld [vmem:[#allocation2 + $0x28] sm:$0xff]  ;;  %v1910_v34 = vld [vmem:[#allocation2 + $0xf8] sm:$0xff]  ;;  %v1947_v32 = vadd.f32 %v3478_v61, %v1909_v26 }
 0x54e   : > { %1956 = vst [vmem:[%s2963_s30 + $0x28] sm:$0xff] %v1924_v22  ;;  %v1907_v3 = vld [vmem:[#allocation2 + $0x10] sm:$0xff]  ;;  %v1944_v12 = vadd.f32 %v3480_v50, %v1906_v10  ;;  %v1946_v13 = vadd.f32 %v3480_v50, %v1908_v18  ;;  %v1911_v9 = vld [vmem:[#allocation2 + $0x20] sm:$0xff]  ;;  %v1912_v25 = vld [vmem:[#allocation2 + $0x98] sm:$0xff]  ;;  %v1948_v63 = vadd.f32 %v3480_v50, %v1910_v34 }
 0x54f   : > { %1957 = vst [vmem:[%s2963_s30 + $0x30] sm:$0xff] %v1925_v8  ;;  %v1945_v27 = vadd.f32 %v3478_v61, %v1907_v3  ;;  %v1949_v51 = vadd.f32 %v3478_v61, %v1911_v9  ;;  %v1950_v42 = vadd.f32 %v3480_v50, %v1912_v25 }
 0x550   : > { %1958 = vst [vmem:[%s2963_s30 + $0x38] sm:$0xff] %v1926_v35 }
 0x551   : > { %1959 = vst [vmem:[%s2963_s30 + $0x40] sm:$0xff] %v1927_v52 }
 0x552   : > { %1960 = vst [vmem:[%s2963_s30 + $0x48] sm:$0xff] %v1928_v28 }
 0x553   : > { %1961 = vst [vmem:[%s2963_s30 + $0x50] sm:$0xff] %v1929_v23 }
 0x554   : > { %1962 = vst [vmem:[%s2963_s30 + $0x58] sm:$0xff] %v1930_v0 }
 0x555   : > { %1963 = vst [vmem:[%s2963_s30 + $0x60] sm:$0xff] %v1931_v1 }
 0x556   : > { %1964 = vst [vmem:[%s2963_s30 + $0x68] sm:$0xff] %v1932_v6 }
 0x557   : > { %1965 = vst [vmem:[%s2963_s30 + $0x70] sm:$0xff] %v1933_v57 }
 0x558   : > { %1966 = vst [vmem:[%s2963_s30 + $0x78] sm:$0xff] %v1934_v59 }
 0x559   : > { %1967 = vst [vmem:[%s2963_s30 + $0x80] sm:$0xff] %v1935_v4 }
 0x55a   : > { %1968 = vst [vmem:[%s2963_s30 + $0x88] sm:$0xff] %v1936_v58 }
 0x55b   : > { %1969 = vst [vmem:[%s2963_s30 + $0x90] sm:$0xff] %v1937_v39 }
 0x55c   : > { %1970 = vst [vmem:[%s2963_s30 + $0x98] sm:$0xff] %v1938_v54 }
 0x55d   : > { %1971 = vst [vmem:[%s2963_s30 + $0xa0] sm:$0xff] %v1939_v2 }
 0x55e   : > { %1972 = vst [vmem:[%s2963_s30 + $0xa8] sm:$0xff] %v1940_v49 }
 0x55f   : > { %1973 = vst [vmem:[%s2963_s30 + $0xb0] sm:$0xff] %v1941_v37 }
 0x560   : > { %1974 = vst [vmem:[%s2963_s30 + $0xb8] sm:$0xff] %v1942_v33 }
 0x561   : > { %1975 = vst [vmem:[%s2963_s30 + $0xc0] sm:$0xff] %v1943_v20 }
 0x562   : > { %1976 = vst [vmem:[%s2963_s30 + $0xc8] sm:$0xff] %v1944_v12 }
 0x563   : > { %1977 = vst [vmem:[%s2963_s30 + $0xd0] sm:$0xff] %v1945_v27 }
 0x564   : > { %1978 = vst [vmem:[%s2963_s30 + $0xd8] sm:$0xff] %v1946_v13 }
 0x565   : > { %1979 = vst [vmem:[%s2963_s30 + $0xe0] sm:$0xff] %v1947_v32 }
 0x566   : > { %1980 = vst [vmem:[%s2963_s30 + $0xe8] sm:$0xff] %v1948_v63 }
 0x567   : > { %1981 = vst [vmem:[%s2963_s30 + $0xf0] sm:$0xff] %v1949_v51 }
 0x568   : > { %1982 = vst [vmem:[%s2963_s30 + $0xf8] sm:$0xff] %v1950_v42 }
 0x569 PF: > { %s2539_s22 = sshll.u32 %s2779_s13, 8  ;;  %s3642_s29 = sld [smem:[#allocation23_spill]] }
 0x56a   : > { %s1996_s28 = sshll.u32 %s2963_s30, 4  ;;  %s3643_s17 = sand.u32 1, %s2767_s10   ;;  %s1997_s28 = int_to_ptr.vmem [resolvable:$true] %s1996_s28 }
 0x56b   : > { %s1984_s23 = scalar_lea.sflag [#allocation4], %s3643_s17 }
 0x56f   : > { %s1995_s24 = scalar_lea.hbm %s3642_s29, %s2539_s22  ;;  %s2717_s13 = scalar_lea.hbm %s3642_s29, 512 }
 0x570   : > { %s1998_s18 = sshll.u32 %s1995_s24, 4  ;;  %s1999_s18 = int_to_ptr.hbm [resolvable:$true] %s1998_s18 }
 0x571   : > { %s2711_s15 = sshra.s32 %s1999_s18, 4  ;;  %s2712_s15 = int_to_ptr.hbm [resolvable:$true] %s2711_s15 }
 0x572   : > { %s2713_s19 = scalar_lea.hbm %s2712_s15, 256  ;;  %p2718_p6 = scmp.lt.s32.totalorder %s2712_s15, %s3642_s29 }
 0x573   : > { %p2714_p2 = scmp.ne.s32.totalorder %s2712_s15, %s2713_s19  ;;  %p2719_p7 = scmp.lt.s32.totalorder %s2717_s13, %s2713_s19 }
 0x575   : > { %p2715_p4 = pnand %p2714_p2, %p2895_p3  ;;  %p2720_p8 = por %p2719_p7, %p2718_p6 }
 0x577   : > { %p2716_p5 = pneg %p2715_p4 }
 0x579   : > { %p2721_p10 = pnand %p2720_p8, %p2716_p5 }
 0x57b   : > { %2724 = shalt.err (!%p2721_p10)
}
 0x57c   : > { %s2794_s30 = smov 256   ;;  %s2795_s2 = smov 16  }
 0x57d   : > { %2556 = dma.vmem_to_hbm [thread:$0]  (%p2895_p3), %s1997_s28, 4096, %s1999_s18, %s1984_s23, %s2794_s30, %s2794_s30, %s2795_s2  }
 0x57e PF: > { %s3644_s11 = sld [smem:[#allocation10_spill]] }
 0x57f   : > { %s3645_s16 = sld [smem:[#allocation6_spill]] }
 0x584   : > { %p2562_p11 = scmp.ge.s32.totalorder %s3644_s11, 2 }
 0x585   : > { %s2013_s9 = sand.u32 1, %s3645_s16  }
 0x586   : > { %p2559_p12 = pnand %p2562_p11, %p2905_p9  ;;  %s2014_s21 = scalar_lea.sflag [#allocation4], %s2013_s9 }
 0x588   : > { %p2560_p13 = pneg %p2559_p12 }
 0x58a   : > { %2758 = dma.done.wait (%p2560_p13), %s2014_s21, 4096  }
 0x58b   : > { %2760 = vsyncadd (%p2560_p13), %s2014_s21, 4294963200  ;;  %s22_s16 = sadd.s32 1, %s3644_s11   ;;  %s3647_s22 = sld [smem:[#allocation7_spill]] }
 0x58c   : > { %p19_p0 = scmp.ge.s32.totalorder %s22_s16, 18   ;;  %s3648_s11 = sld [smem:[#allocation15_spill]] }
 0x58d   : > { %s3649_s12 = sld [smem:[#allocation8_spill]]  ;;  %s3653_s30 = smov %s2767_s10 }
 0x58e   : > { %s3650_s13 = sld [smem:[#allocation9_spill]]  ;;  %21 = sbr.rel (!%p19_p0) target bundleno = 10 (0xa), region = 120 }
 0x58f   : > { %s3651_s14 = sld [smem:[#allocation11_spill]] }
 0x590   : > { %s3652_s15 = sld [smem:[#allocation13_spill]] }
 0x591   : > { %s3654_s10 = smov %s3647_s22 }
 0x593   :  { %2020 = vsyncpa [#allocation4], 1 }
 0x594   :  { %2022 = vsyncpa [#allocation4 + $0x1], 1 }

</bundles_post_ra>
